<compile_context>
chip_gen: v7x
topology: tpu7x:2x2x1
jax: 0.10.0
libtpu: 0.0.40
codegen_flags: <defaults>
</compile_context>

<pallas_src>
from functools import partial

import jax
import jax.numpy as jnp
from jax import lax
from jax.experimental import pallas as pl
from jax.experimental.pallas import tpu as pltpu


# -----------------------------------------------------------------------------
# Kernel 1: fused QKV projection -> head-major (B, H, S, hd) Q, K, V
# -----------------------------------------------------------------------------
def _qkv_proj_kernel(x_ref, wqkv_ref, bqkv_ref, q_ref, k_ref, v_ref, *, num_heads):
    ts, d_model = x_ref.shape[1], x_ref.shape[2]
    hd = d_model // num_heads

    # One lane-dense matmul: (ts, D) @ (D, 3D); accumulate in f32.
    p = jnp.dot(x_ref[0], wqkv_ref[...],
                preferred_element_type=jnp.float32) + bqkv_ref[...]

    def head_major(t2d):  # (ts, H*hd) head-major cols -> (H, ts, hd)
        return jnp.transpose(t2d.reshape(ts, num_heads, hd), (1, 0, 2))

    q_ref[0] = head_major(p[:, :d_model]).astype(q_ref.dtype)
    k_ref[0] = head_major(p[:, d_model:2 * d_model]).astype(k_ref.dtype)
    v_ref[0] = head_major(p[:, 2 * d_model:]).astype(v_ref.dtype)


# -----------------------------------------------------------------------------
# Kernel 2: flash attention (online softmax over kv tiles) + out-proj + LN1
#           + position-wise FFN + LN2, fused.  Grid = (batch, q_tiles, kv_tiles).
# -----------------------------------------------------------------------------
def _attn_ffn_kernel(
    x_ref, q_ref, k_ref, v_ref,
    wout_ref, bout_ref, g1_ref, be1_ref,
    w1_ref, b1_ref, w2_ref, b2_ref, g2_ref, be2_ref,
    o_ref,
    m_sc, l_sc, acc_sc,
    *, eps):
    ki = pl.program_id(2)
    nk = pl.num_programs(2)
    H, tq, hd = q_ref.shape[1], q_ref.shape[2], q_ref.shape[3]
    mm_dtype = q_ref.dtype  # MXU operand dtype (bf16 by default)

    # ---- per query tile: reset online-softmax state ----
    @pl.when(ki == 0)
    def _init():
        m_sc[...] = jnp.full(m_sc.shape, -jnp.inf, m_sc.dtype)
        l_sc[...] = jnp.zeros(l_sc.shape, l_sc.dtype)
        acc_sc[...] = jnp.zeros(acc_sc.shape, acc_sc.dtype)

    # ---- online softmax over KV tiles (all heads in one batched contraction) ----
    q = q_ref[0]                                   # (H, tq,  hd), scale pre-folded into Wq
    k = k_ref[0]                                   # (H, tkv, hd)
    v = v_ref[0]                                   # (H, tkv, hd)
    s = jnp.einsum('hqf,hkf->hqk', q, k,
                   preferred_element_type=jnp.float32)          # (H, tq, tkv) f32
    m_prev = m_sc[...]
    m_new = jnp.maximum(m_prev, jnp.max(s, axis=-1, keepdims=True))
    alpha = jnp.exp(m_prev - m_new)
    p = jnp.exp(s - m_new)
    l_sc[...] = alpha * l_sc[...] + jnp.sum(p, axis=-1, keepdims=True)
    acc_sc[...] = alpha * acc_sc[...] + jnp.einsum(
        'hqk,hkf->hqf', p.astype(mm_dtype), v, preferred_element_type=jnp.float32)
    m_sc[...] = m_new

    # ---- finalize: out-proj + residual + LN1 + FFN + residual + LN2 ----
    @pl.when(ki == nk - 1)
    def _finalize():
        d_model = H * hd
        # Exact divide (runs once per q tile -> negligible cost, tighter accuracy).
        vals = acc_sc[...] / l_sc[...]                           # (H, tq, hd) f32
        # Relayout to (tq, D) head-major columns, then one full-depth matmul.
        vals2d = jnp.transpose(vals, (1, 0, 2)).reshape(tq, d_model)
        attn = jnp.dot(vals2d.astype(mm_dtype), wout_ref[...],
                       preferred_element_type=jnp.float32) + bout_ref[...]

        # dropout1 = identity; residual + LayerNorm 1 (stats in f32)
        y = x_ref[0].astype(jnp.float32) + attn
        mu = jnp.mean(y, axis=-1, keepdims=True)
        var = jnp.mean((y - mu) ** 2, axis=-1, keepdims=True)
        y = (y - mu) * lax.rsqrt(var + eps)                      # EUP rsqrt
        y = g1_ref[...] * y + be1_ref[...]

        # Position-wise FFN: Linear -> ReLU -> (dropout = id) -> Linear
        hid = jnp.dot(y.astype(mm_dtype), w1_ref[...],
                      preferred_element_type=jnp.float32) + b1_ref[...]
        hid = jnp.maximum(hid, 0.0)
        ffn = jnp.dot(hid.astype(mm_dtype), w2_ref[...],
                      preferred_element_type=jnp.float32) + b2_ref[...]

        # dropout2 = identity; residual + LayerNorm 2
        z = y + ffn
        mu2 = jnp.mean(z, axis=-1, keepdims=True)
        var2 = jnp.mean((z - mu2) ** 2, axis=-1, keepdims=True)
        z = (z - mu2) * lax.rsqrt(var2 + eps)
        z = g2_ref[...] * z + be2_ref[...]

        o_ref[0] = z.astype(o_ref.dtype)


# -----------------------------------------------------------------------------
# Wrapper
# -----------------------------------------------------------------------------
def encoder_layer(x, params, *, num_heads, eps=1e-5, mm_dtype=jnp.bfloat16,
                  tq=None, tkv=None, tproj=None, vmem_limit_bytes=None):
    B, S, D = x.shape
    assert D % num_heads == 0, "d_model must be divisible by n_head"
    H = num_heads
    hd = D // H
    f32 = jnp.float32

    def _pick(t):
        t = min(S, 256) if t is None else t     # v6e/v5e: bigger tiles by default
        assert S % t == 0 and (t % 8 == 0 or t == S), f"bad sequence tile {t} for S={S}"
        return t
    tq, tkv, tproj = _pick(tq), _pick(tkv), _pick(tproj)

    if vmem_limit_bytes is None:
        # ~3/4 of the chip's VMEM, capped at 100 MiB (=> ~96 MiB on v5e/v6e,
        # ~48 MiB on v7x's 64 MiB parts).
        try:
            cap = int(pltpu.get_tpu_info().vmem_capacity_bytes)
            vmem_limit_bytes = min((cap * 3) // 4, 100 * 1024 * 1024)
        except Exception:
            vmem_limit_bytes = 48 * 1024 * 1024

    # ---- host-side weight prep (all in f32, cast to mm_dtype last) ----
    scale = 1.0 / float(hd) ** 0.5
    w = params["wqkv"].astype(f32).reshape(H, 3, hd, D)      # (h, {q,k,v}, feat, d_in)
    b = params["bqkv"].astype(f32).reshape(H, 3, hd)
    wq = (w[:, 0] * scale).reshape(D, D)                     # fold 1/sqrt(hd) into Wq (f32)
    wk = w[:, 1].reshape(D, D)
    wv = w[:, 2].reshape(D, D)
    bq = (b[:, 0] * scale).reshape(D)
    bk = b[:, 1].reshape(D)
    bv = b[:, 2].reshape(D)
    # Output columns ordered [Q head-major | K head-major | V head-major].
    wqkv_t = jnp.concatenate([wq, wk, wv], axis=0).T.astype(mm_dtype)   # (D, 3D)
    bqkv = jnp.concatenate([bq, bk, bv]).reshape(1, 3 * D).astype(f32)

    wout_t = params["wout"].astype(f32).T.astype(mm_dtype)   # (D, D); in-features head-major
    bout = params["bout"].reshape(1, D).astype(f32)
    w1_t = params["w1"].astype(f32).T.astype(mm_dtype)       # (D, ffn)
    b1 = params["b1"].reshape(1, -1).astype(f32)
    w2_t = params["w2"].astype(f32).T.astype(mm_dtype)       # (ffn, D)
    b2 = params["b2"].reshape(1, D).astype(f32)
    g1 = params["gamma1"].reshape(1, D).astype(f32)
    be1 = params["beta1"].reshape(1, D).astype(f32)
    g2 = params["gamma2"].reshape(1, D).astype(f32)
    be2 = params["beta2"].reshape(1, D).astype(f32)

    def _const_spec(shape, imap):
        # Constant index map -> fetched once; single-buffer to halve weight VMEM.
        try:
            return pl.BlockSpec(shape, imap, pipeline_mode=pl.Buffered(buffer_count=1))
        except Exception:  # older jax without pipeline_mode / Buffered
            return pl.BlockSpec(shape, imap)

    # ---- pass 1: QKV projection (once per token) ----
    x_mm = x.astype(mm_dtype)
    qkv_shape = jax.ShapeDtypeStruct((B, H, S, hd), mm_dtype)
    q_all, k_all, v_all = pl.pallas_call(
        partial(_qkv_proj_kernel, num_heads=H),
        out_shape=(qkv_shape, qkv_shape, qkv_shape),
        grid=(B, S // tproj),
        in_specs=[
            pl.BlockSpec((1, tproj, D), lambda b, si: (b, si, 0)),
            _const_spec((D, 3 * D), lambda b, si: (0, 0)),
            _const_spec((1, 3 * D), lambda b, si: (0, 0)),
        ],
        out_specs=(
            pl.BlockSpec((1, H, tproj, hd), lambda b, si: (b, 0, si, 0)),
            pl.BlockSpec((1, H, tproj, hd), lambda b, si: (b, 0, si, 0)),
            pl.BlockSpec((1, H, tproj, hd), lambda b, si: (b, 0, si, 0)),
        ),
        compiler_params=pltpu.CompilerParams(
            dimension_semantics=("parallel", "parallel"),
            vmem_limit_bytes=vmem_limit_bytes),
    )(x_mm, wqkv_t, bqkv)

    # ---- pass 2: fused flash attention + out-proj + LN1 + FFN + LN2 ----
    consts = (wout_t, bout, g1, be1, w1_t, b1, w2_t, b2, g2, be2)
    const_specs = [_const_spec(a.shape, lambda b, qi, ki: (0, 0)) for a in consts]

    return pl.pallas_call(
        partial(_attn_ffn_kernel, eps=eps),
        out_shape=jax.ShapeDtypeStruct((B, S, D), x.dtype),
        grid=(B, S // tq, S // tkv),
        in_specs=[
            pl.BlockSpec((1, tq, D), lambda b, qi, ki: (b, qi, 0)),        # residual x (f32)
            pl.BlockSpec((1, H, tq, hd), lambda b, qi, ki: (b, 0, qi, 0)),  # Q
            pl.BlockSpec((1, H, tkv, hd), lambda b, qi, ki: (b, 0, ki, 0)),  # K
            pl.BlockSpec((1, H, tkv, hd), lambda b, qi, ki: (b, 0, ki, 0)),  # V
        ] + const_specs,
        out_specs=pl.BlockSpec((1, tq, D), lambda b, qi, ki: (b, qi, 0)),
        scratch_shapes=[
            pltpu.VMEM((H, tq, 1), f32),    # running max
            pltpu.VMEM((H, tq, 1), f32),    # running denom
            pltpu.VMEM((H, tq, hd), f32),   # output accumulator
        ],
        compiler_params=pltpu.CompilerParams(
            dimension_semantics=("parallel", "parallel", "arbitrary"),
            vmem_limit_bytes=vmem_limit_bytes),
    )(x, q_all, k_all, v_all, *consts)


# -----------------------------------------------------------------------------
# Pure-JAX reference matching the PyTorch module's forward (eval mode).
# -----------------------------------------------------------------------------
def encoder_layer_ref(x, params, *, num_heads, eps=1e-5):
    B, S, D = x.shape
    hd = D // num_heads
    x = x.astype(jnp.float32)

    qkv = x @ params["wqkv"].T + params["bqkv"]                  # (B, S, 3D)
    qkv = qkv.reshape(B, S, num_heads, 3 * hd).transpose(0, 2, 1, 3)
    q, k, v = qkv[..., :hd], qkv[..., hd:2 * hd], qkv[..., 2 * hd:]
    s = jnp.einsum("bhqd,bhkd->bhqk", q, k) / jnp.sqrt(jnp.float32(hd))
    p = jax.nn.softmax(s, axis=-1)
    vals = jnp.einsum("bhqk,bhkd->bhqd", p, v).transpose(0, 2, 1, 3).reshape(B, S, D)
    attn = vals @ params["wout"].T + params["bout"]

    def ln(t, g, b):
        mu = jnp.mean(t, axis=-1, keepdims=True)
        var = jnp.mean((t - mu) ** 2, axis=-1, keepdims=True)
        return g * ((t - mu) / jnp.sqrt(var + eps)) + b

    y = ln(x + attn, params["gamma1"], params["beta1"])
    h = jnp.maximum(y @ params["w1"].T + params["b1"], 0.0)
    f = h @ params["w2"].T + params["b2"]
    return ln(y + f, params["gamma2"], params["beta2"])


if __name__ == "__main__":
    # Lane-dense demo shapes (hd = 128); tiles chosen so the flash accumulation
    # over kv tiles and the q / projection tiling are actually exercised.
    B, S, D = 2, 32, 256
    n_head, ffn_hidden = 2, 512

    key = jax.random.PRNGKey(0)
    ks = jax.random.split(key, 13)
    init = lambda k, shape: (0.05 * jax.random.normal(k, shape)).astype(jnp.float32)

    params = dict(
        wqkv=init(ks[0], (3 * D, D)), bqkv=init(ks[1], (3 * D,)),
        wout=init(ks[2], (D, D)), bout=init(ks[3], (D,)),
        gamma1=(1.0 + 0.1 * jax.random.normal(ks[4], (D,))).astype(jnp.float32),
        beta1=init(ks[5], (D,)),
        w1=init(ks[6], (ffn_hidden, D)), b1=init(ks[7], (ffn_hidden,)),
        w2=init(ks[8], (D, ffn_hidden)), b2=init(ks[9], (D,)),
        gamma2=(1.0 + 0.1 * jax.random.normal(ks[10], (D,))).astype(jnp.float32),
        beta2=init(ks[11], (D,)),
    )
    x = jax.random.normal(ks[12], (B, S, D), dtype=jnp.float32)

    ref = jax.block_until_ready(encoder_layer_ref(x, params, num_heads=n_head))

    # f32 MXU path: tight correctness check against the pure-JAX reference.
    out_f32 = jax.block_until_ready(
        encoder_layer(x, params, num_heads=n_head, mm_dtype=jnp.float32,
                      tq=16, tkv=16, tproj=16))
    assert out_f32.shape == (B, S, D)
    err32 = float(jnp.max(jnp.abs(out_f32 - ref)))
    assert jnp.allclose(out_f32, ref, atol=2e-3, rtol=2e-3), err32

    # bf16 MXU path (default): matmuls run in bf16, stats/residuals in f32.
    out_bf16 = jax.block_until_ready(
        encoder_layer(x, params, num_heads=n_head, tq=16, tkv=16, tproj=16))
    errbf = float(jnp.max(jnp.abs(out_bf16.astype(jnp.float32) - ref)))
    assert jnp.allclose(out_bf16.astype(jnp.float32), ref, atol=1e-1, rtol=1e-1), errbf

    print("KERNEL_OK")
</pallas_src>

<mosaic_0001>
module attributes {stable_mosaic.version = 11 : i64} {
  func.func @_qkv_proj_kernel(%arg0: i32, %arg1: i32, %arg2: memref<1x16x256xf32, #tpu.memory_space<vmem>>, %arg3: memref<256x768xf32, #tpu.memory_space<vmem>>, %arg4: memref<1x768xf32, #tpu.memory_space<vmem>>, %arg5: memref<1x2x16x128xf32, #tpu.memory_space<vmem>>, %arg6: memref<1x2x16x128xf32, #tpu.memory_space<vmem>>, %arg7: memref<1x2x16x128xf32, #tpu.memory_space<vmem>>) attributes {dimension_semantics = [#tpu.dimension_semantics<parallel>, #tpu.dimension_semantics<parallel>], iteration_bounds = array<i64: 2, 2>, scalar_prefetch = 0 : i64, scratch_operands = 0 : i64, tpu.core_type = #tpu.core_type<tc>, window_params = [{transform_indices = @transform_0, window_bounds = array<i64: 1, 16, 256>}, {pipeline_mode = #tpu.pipeline_mode<synchronous>, transform_indices = @transform_1, window_bounds = array<i64: 256, 768>}, {pipeline_mode = #tpu.pipeline_mode<synchronous>, transform_indices = @transform_2, window_bounds = array<i64: 1, 768>}, {transform_indices = @transform_3, window_bounds = array<i64: 1, 2, 16, 128>}, {transform_indices = @transform_4, window_bounds = array<i64: 1, 2, 16, 128>}, {transform_indices = @transform_5, window_bounds = array<i64: 1, 2, 16, 128>}]} {
    %c0 = arith.constant 0 : index
    %c0_0 = arith.constant 0 : index
    %c0_1 = arith.constant 0 : index
    %0 = vector.load %arg2[%c0, %c0_0, %c0_1] : memref<1x16x256xf32, #tpu.memory_space<vmem>>, vector<1x16x256xf32>
    %1 = vector.shape_cast %0 : vector<1x16x256xf32> to vector<16x256xf32>
    %c0_2 = arith.constant 0 : index
    %c0_3 = arith.constant 0 : index
    %2 = vector.load %arg3[%c0_2, %c0_3] : memref<256x768xf32, #tpu.memory_space<vmem>>, vector<256x768xf32>
    %cst = arith.constant dense<0.000000e+00> : vector<16x768xf32>
    %3 = tpu.matmul %1, %2, %cst {dimension_numbers = #tpu.dot_dimension_numbers<[1], [0], [0], [1], [0, 0, 1, 1], [], []>} : vector<16x256xf32>, vector<256x768xf32>, vector<16x768xf32> -> vector<16x768xf32>
    %c0_4 = arith.constant 0 : index
    %c0_5 = arith.constant 0 : index
    %4 = vector.load %arg4[%c0_4, %c0_5] : memref<1x768xf32, #tpu.memory_space<vmem>>, vector<1x768xf32>
    %5 = vector.broadcast %4 : vector<1x768xf32> to vector<16x768xf32>
    %6 = arith.addf %3, %5 : vector<16x768xf32>
    %7 = vector.extract_strided_slice %6 {offsets = [0, 0], sizes = [16, 256], strides = [1, 1]} : vector<16x768xf32> to vector<16x256xf32>
    %8 = vector.shape_cast %7 : vector<16x256xf32> to vector<16x2x128xf32>
    %9 = tpu.transpose %8, [1, 0, 2] : vector<16x2x128xf32> -> vector<2x16x128xf32>
    %c0_6 = arith.constant 0 : index
    %c0_7 = arith.constant 0 : index
    %c0_8 = arith.constant 0 : index
    %c0_9 = arith.constant 0 : index
    %10 = vector.load %arg5[%c0_6, %c0_7, %c0_8, %c0_9] : memref<1x2x16x128xf32, #tpu.memory_space<vmem>>, vector<1x2x16x128xf32>
    %11 = vector.shape_cast %10 : vector<1x2x16x128xf32> to vector<2x16x128xf32>
    %12 = vector.shape_cast %9 : vector<2x16x128xf32> to vector<1x2x16x128xf32>
    tpu.vector_store %arg5[%c0_6, %c0_7, %c0_8, %c0_9], %12 {strides = array<i32>} : memref<1x2x16x128xf32, #tpu.memory_space<vmem>>, vector<1x2x16x128xf32>,
    %13 = vector.extract_strided_slice %6 {offsets = [0, 256], sizes = [16, 256], strides = [1, 1]} : vector<16x768xf32> to vector<16x256xf32>
    %14 = vector.shape_cast %13 : vector<16x256xf32> to vector<16x2x128xf32>
    %15 = tpu.transpose %14, [1, 0, 2] : vector<16x2x128xf32> -> vector<2x16x128xf32>
    %c0_10 = arith.constant 0 : index
    %c0_11 = arith.constant 0 : index
    %c0_12 = arith.constant 0 : index
    %c0_13 = arith.constant 0 : index
    %16 = vector.load %arg6[%c0_10, %c0_11, %c0_12, %c0_13] : memref<1x2x16x128xf32, #tpu.memory_space<vmem>>, vector<1x2x16x128xf32>
    %17 = vector.shape_cast %16 : vector<1x2x16x128xf32> to vector<2x16x128xf32>
    %18 = vector.shape_cast %15 : vector<2x16x128xf32> to vector<1x2x16x128xf32>
    tpu.vector_store %arg6[%c0_10, %c0_11, %c0_12, %c0_13], %18 {strides = array<i32>} : memref<1x2x16x128xf32, #tpu.memory_space<vmem>>, vector<1x2x16x128xf32>,
    %19 = vector.extract_strided_slice %6 {offsets = [0, 512], sizes = [16, 256], strides = [1, 1]} : vector<16x768xf32> to vector<16x256xf32>
    %20 = vector.shape_cast %19 : vector<16x256xf32> to vector<16x2x128xf32>
    %21 = tpu.transpose %20, [1, 0, 2] : vector<16x2x128xf32> -> vector<2x16x128xf32>
    %c0_14 = arith.constant 0 : index
    %c0_15 = arith.constant 0 : index
    %c0_16 = arith.constant 0 : index
    %c0_17 = arith.constant 0 : index
    %22 = vector.load %arg7[%c0_14, %c0_15, %c0_16, %c0_17] : memref<1x2x16x128xf32, #tpu.memory_space<vmem>>, vector<1x2x16x128xf32>
    %23 = vector.shape_cast %22 : vector<1x2x16x128xf32> to vector<2x16x128xf32>
    %24 = vector.shape_cast %21 : vector<2x16x128xf32> to vector<1x2x16x128xf32>
    tpu.vector_store %arg7[%c0_14, %c0_15, %c0_16, %c0_17], %24 {strides = array<i32>} : memref<1x2x16x128xf32, #tpu.memory_space<vmem>>, vector<1x2x16x128xf32>,
    return
  }
  func.func @transform_0(%arg0: i32, %arg1: i32) -> (i32, i32, i32) {
    %c0_i32 = arith.constant 0 : i32
    %c0_i32_0 = arith.constant 0 : i32
    return %arg0, %arg1, %c0_i32 : i32, i32, i32
  }
  func.func @transform_1(%arg0: i32, %arg1: i32) -> (i32, i32) {
    %c0_i32 = arith.constant 0 : i32
    %c0_i32_0 = arith.constant 0 : i32
    %c0_i32_1 = arith.constant 0 : i32
    return %c0_i32, %c0_i32_0 : i32, i32
  }
  func.func @transform_2(%arg0: i32, %arg1: i32) -> (i32, i32) {
    %c0_i32 = arith.constant 0 : i32
    %c0_i32_0 = arith.constant 0 : i32
    %c0_i32_1 = arith.constant 0 : i32
    return %c0_i32, %c0_i32_0 : i32, i32
  }
  func.func @transform_3(%arg0: i32, %arg1: i32) -> (i32, i32, i32, i32) {
    %c0_i32 = arith.constant 0 : i32
    %c0_i32_0 = arith.constant 0 : i32
    %c0_i32_1 = arith.constant 0 : i32
    return %arg0, %c0_i32, %arg1, %c0_i32_0 : i32, i32, i32, i32
  }
  func.func @transform_4(%arg0: i32, %arg1: i32) -> (i32, i32, i32, i32) {
    %c0_i32 = arith.constant 0 : i32
    %c0_i32_0 = arith.constant 0 : i32
    %c0_i32_1 = arith.constant 0 : i32
    return %arg0, %c0_i32, %arg1, %c0_i32_0 : i32, i32, i32, i32
  }
  func.func @transform_5(%arg0: i32, %arg1: i32) -> (i32, i32, i32, i32) {
    %c0_i32 = arith.constant 0 : i32
    %c0_i32_0 = arith.constant 0 : i32
    %c0_i32_1 = arith.constant 0 : i32
    return %arg0, %c0_i32, %arg1, %c0_i32_0 : i32, i32, i32, i32
  }
}

</mosaic_0001>

<bundles_post_ra>
// kernel: tpu_custom_call.1
= control target key start
LH: loop header
LB: loop body
LE: loop exit
PB: predicated region body
PF: predicated region fallthrough
CT: control target
= control target key end

     0   :  { %s2843_s0 = inlined_call_operand.hbm [shape: f32[2,32,256], index: 0, kind: input, shape index: {}]   ;;  %s2844_s1 = inlined_call_operand.hbm [shape: f32[256,768], index: 1, kind: input, shape index: {}]   ;;  %s2845_s2 = inlined_call_operand.vmem [shape: f32[1,768], index: 2, kind: input, shape index: {}]   ;;  %s2846_s3 = inlined_call_operand.hbm [shape: f32[2,2,32,128], index: 3, kind: output, shape index: {0}]   ;;  %s2847_s4 = inlined_call_operand.hbm [shape: f32[2,2,32,128], index: 4, kind: output, shape index: {1}]   ;;  %s2848_s5 = inlined_call_operand.hbm [shape: f32[2,2,32,128], index: 5, kind: output, shape index: {2}]  }
   0x1   :  { %2858 = sst [smem:[#allocation26_spill]] %s2844_s1 }
   0x2   :  { %2859 = sst [smem:[#allocation27_spill]] %s2848_s5 }
   0x3   :  { %11 = vsyncpa [#allocation3], 0 }
   0x4   :  { %13 = vsyncpa [#allocation3 + $0x1], 0 }
   0x5   :  { %14 = vsyncpa [#allocation6], 0 }
   0x6   :  { %15 = vsyncpa [#allocation4], 0 }
   0x7   :  { %17 = vsyncpa [#allocation4 + $0x1], 0 }
   0x8   :  { %18 = vsyncpa [#allocation9], 0 }
   0x9   :  { %20 = vsyncpa [#allocation9 + $0x1], 0  ;;  %s2396_s18 = smov 0   ;;  %s2398_s19 = smov 0  }
   0xa   :  { %s2400_s20 = smov 0   ;;  %s2402_s21 = smov 0  }
   0xb   :  { %s2404_s22 = smov 0   ;;  %s2406_s23 = smov 0  }
   0xc   :  { %s2408_s24 = smov 0   ;;  %s2410_s25 = smov 0  }
   0xd LB: > { %2860 = sst [smem:[#allocation21_spill]] %s2306_s18  ;;  %s2437_s26 = sadd.s32 4294967295, %s2334_s25   ;;  %s2334_s25 = sphi %s2410_s25, %s26_s25   ;;  %s2330_s24 = sphi %s2408_s24, %s2890_s24   ;;  %s2326_s23 = sphi %s2406_s23, %s2884_s23   ;;  %s2322_s22 = sphi %s2404_s22, %s2889_s22   ;;  %s2318_s21 = sphi %s2402_s21, %s2883_s21   ;;  %s2314_s20 = sphi %s2400_s20, %s2888_s20   ;;  %s2310_s19 = sphi %s2398_s19, %s2887_s19   ;;  %s2306_s18 = sphi %s2396_s18, %s2886_s18  }
   0xe   : > { %2861 = sst [smem:[#allocation22_spill]] %s2326_s23  ;;  %s2852_s27 = sadd.s32 4294967294, %s2334_s25  }
   0xf   : > { %p60_p0 = scmp.ne.s32.totalorder %s2310_s19, %s2306_s18  ;;  %p2849_p1 = scmp.eq.s32.totalorder %s2437_s26, 0 }
  0x10   : > { %p134_p3 = scmp.eq.s32.totalorder %s2852_s27, 3  ;;  %p1788_p5 = scmp.ge.s32.totalorder %s2334_s25, 1 }
  0x11   : > { %p2448_p4 = por %p2849_p1, %p60_p0  ;;  %p197_p7 = scmp.lt.s32.totalorder %s2334_s25, 5 }
  0x12   : > { %p2453_p6 = por %p134_p3, %p60_p0  ;;  %s2336_s6 = smov [#allocation5]  }
  0x13   : > { %s2862_s28 = scalar_select %p2448_p4, 1, 0 }
  0x14   : > { %s2863_s29 = scalar_select %p2453_p6, 1, 0 }
  0x15   : > { %p2458_p8 = pnand %p1788_p5, %p197_p7  ;;  %s209_s7 = sshll.u32 %s2336_s6, 4  ;;  %s210_s7 = int_to_ptr.vmem [resolvable:$true] %s209_s7 }
  0x16   : > { %2864 = sst [smem:[#allocation23_spill]] %s2863_s29  ;;  %s2867_s1 = sld [smem:[#allocation26_spill]] }
  0x17   : > { %s2865_s30 = scalar_select %p2458_p8, 1, 0 }
  0x18   : > { %p2083_p9 = pneg %p2458_p8 }
  0x1a   : > { %p2466_p10 = pnand %p2083_p9, %p2849_p1 }
  0x1c   : > { %s2198_s11 = scalar_lea.hbm %s2867_s1, 24576  ;;  %p2200_p12 = pneg %p2466_p10 }
  0x1d   : > { %p2199_p11 = scmp.ne.s32.totalorder %s2867_s1, %s2198_s11  ;;  %p2205_p3 = scmp.lt.u32.totalorder %s2198_s11, %s2867_s1 }
  0x1f   : > { %p2201_p13 = pnand %p2200_p12, %p2199_p11 }
  0x21   : > { %p2202_p0 = pneg %p2201_p13 }
  0x23   : > { %p2207_p5 = pnand %p2205_p3, %p2202_p0 }
  0x25   : > { %2210 = shalt.err (!%p2207_p5)
}
  0x26   : > { %s2211_s16 = scalar_lea.vmem %s210_s7, 24576  ;;  %p2219_p2 = scmp.lt.s32.totalorder %s210_s7, %s210_s7 }
  0x27   : > { %p2212_p7 = scmp.ne.s32.totalorder %s210_s7, %s2211_s16  ;;  %p2220_p6 = scmp.lt.s32.totalorder %s2211_s16, %s2211_s16 }
  0x29   : > { %p2214_p9 = pnand %p2212_p7, %p2200_p12  ;;  %p2221_p4 = por %p2220_p6, %p2219_p2 }
  0x2b   : > { %p2215_p1 = pneg %p2214_p9 }
  0x2d   : > { %p2222_p8 = pnand %p2221_p4, %p2215_p1 }
  0x2f   : > { %2225 = shalt.err (!%p2222_p8)
}
  0x30   : > { %s2337_s17 = smov 768   ;;  %s2338_s6 = smov 48  }
  0x31   : > { %2086 = dma.hbm_to_vmem [thread:$0]  (!%p2466_p10), %s2867_s1, 24576, %s210_s7, [#allocation6], %s2337_s17, %s2337_s17, %s2338_s6  }
  0x32   : > { %s35_s11 = sadd.s32 1, %s2326_s23  ;;  %s38_s12 = sadd.s32 1, %s2330_s24 }
  0x33   : > { %p36_p1 = scmp.ge.s32.totalorder %s35_s11, 2  ;;  %s47_s13 = sadd.s32 1, %s2314_s20 }
  0x34   : > { %p54_p2 = scmp.ne.s32.totalorder %s2314_s20, %s2310_s19  ;;  %p55_p4 = scmp.eq.s32.totalorder %s2334_s25, 0 }
  0x35   : > { %s2892_s11 = smov (%p36_p1, %s35_s11), 0  ;;  %s2894_s12 = smov (!%p36_p1, %s38_s12), %s2330_s24 }
  0x36   : > { %2868 = sst [smem:[#allocation24_spill]] %s2892_s11  ;;  %s43_s14 = ssub.s32 %s2326_s23, %s2892_s11 }
  0x37   : > { %p40_p6 = scmp.ge.s32.totalorder %s2894_s12, 2  ;;  %p2869_p8 = scmp.eq.s32.totalorder %s2437_s26, 3 }
  0x38   : > { %p2503_p10 = por %p55_p4, %p54_p2  ;;  %p2102_p12 = scmp.lt.s32.totalorder %s2334_s25, 4 }
  0x39   : > { %p2499_p11 = por %p2869_p8, %p54_p2  ;;  %s2896_s12 = smov (%p40_p6, %s2894_s12), 0 }
  0x3a   : > { %2872 = sst [smem:[#allocation25_spill]] %s2896_s12  ;;  %s226_s15 = sand.u32 1, %s2314_s20  }
  0x3b   : > { %s1828_s16 = sshll.u32 %s2326_s23, 2  ;;  %s42_s17 = ssub.s32 %s2330_s24, %s2896_s12 }
  0x3c   : > { %s44_s6 = sor.u32 %s43_s14, %s42_s17  ;;  %s1791_s9 = sshll.u32 %s226_s15, 5 }
  0x3d   : > { %p45_p13 = scmp.eq.s32.totalorder %s44_s6, 0  ;;  %s1794_s10 = sshll.u32 %s2330_s24, 3 }
  0x3e   : > { %s230_s27 = scalar_lea.vmem [#allocation2], %s1791_s9  ;;  %s237_s29 = sadd.s32 %s1828_s16, %s1794_s10 }
  0x3f   : > { %s240_s1 = sshll.u32 %s230_s27, 4  ;;  %s1795_s18 = sshll.u32 %s237_s29, 7  ;;  %s2518_s1 = int_to_ptr.vmem [resolvable:$true] %s240_s1 }
  0x40   : > { %s2516_s11 = scalar_select %p45_p13, %s2314_s20, %s47_s13  }
  0x41   : > { %p2524_p0 = pnand %p2102_p12, %p2503_p10  ;;  %s2531_s14 = scalar_lea.hbm %s2843_s0, %s1795_s18 }
  0x42   : > { %s2533_s27 = scalar_lea.sflag [#allocation3], %s226_s15  ;;  %s2226_s29 = scalar_lea.hbm %s2531_s14, 512 }
  0x43   : > { %p2227_p3 = scmp.ne.s32.totalorder %s2531_s14, %s2226_s29  ;;  %p2228_p5 = pneg %p2524_p0 }
  0x44   : > { %s2231_s12 = scalar_lea.hbm %s2843_s0, 2048  ;;  %p2232_p1 = scmp.lt.u32.totalorder %s2531_s14, %s2843_s0 }
  0x45   : > { %p2229_p7 = pnand %p2228_p5, %p2227_p3  ;;  %p2233_p2 = scmp.lt.u32.totalorder %s2231_s12, %s2226_s29 }
  0x46   : > { %p2235_p6 = scmp.lt.u32.totalorder %s2226_s29, %s2531_s14 }
  0x47   : > { %p2230_p9 = pneg %p2229_p7  ;;  %p2234_p4 = por %p2233_p2, %p2232_p1 }
  0x49   : > { %p2236_p8 = por %p2235_p6, %p2234_p4 }
  0x4b   : > { %p2237_p10 = pnand %p2236_p8, %p2230_p9 }
  0x4d   : > { %2240 = shalt.err (!%p2237_p10)
}
  0x4e   : > { %s2241_s15 = scalar_lea.vmem %s2518_s1, 512  ;;  %s2339_s16 = smov [#allocation2]  }
  0x4f   : > { %p2242_p12 = scmp.ne.s32.totalorder %s2518_s1, %s2241_s15  ;;  %s2246_s17 = sshll.u32 %s2339_s16, 4  ;;  %s2247_s17 = int_to_ptr.vmem [resolvable:$false] %s2246_s17 }
  0x50   : > { %s2248_s6 = scalar_lea.vmem %s2247_s17, 1024  ;;  %p2249_p7 = scmp.lt.s32.totalorder %s2518_s1, %s2247_s17 }
  0x51   : > { %p2244_p13 = pnand %p2242_p12, %p2228_p5  ;;  %p2250_p1 = scmp.lt.s32.totalorder %s2248_s6, %s2241_s15 }
  0x53   : > { %p2245_p3 = pneg %p2244_p13  ;;  %p2251_p2 = por %p2250_p1, %p2249_p7 }
  0x55   : > { %p2252_p4 = pnand %p2251_p2, %p2245_p3 }
  0x57   : > { %2255 = shalt.err (!%p2252_p4)
}
  0x58   : > { %s2340_s9 = smov 256   ;;  %s2341_s10 = smov 16  }
  0x59   : > { %2090 = dma.hbm_to_vmem [thread:$0]  (!%p2524_p0), %s2531_s14, 512, %s2518_s1, %s2533_s27, %s2340_s9, %s2340_s9, %s2341_s10  }
  0x5a   : > { %p2874_p5 = scmp.ne.s32.totalorder %s2865_s30, 0 }
  0x5b   : > { %s2564_s29 = sand.u32 (!%p2874_p5), 1, %s2310_s19   ;;  %p2875_p9 = scmp.ne.s32.totalorder (!%p2874_p5), %s2862_s28, 0 }
  0x5c   : > { %252 = sbr.rel (%p2874_p5) target bundleno = 499 (0x1f3), region = 32  ;;  %s2567_s13 = sshll.u32 (!%p2874_p5), %s2564_s29, 5 }
  0x5d   : > { %s255_s23 = scalar_lea.sflag (!%p2874_p5), [#allocation3], %s2564_s29  ;;  %s2571_s12 = scalar_lea.vmem (!%p2874_p5), [#allocation2], %s2567_s13 }
  0x63   : > { %2289 = dma.done.wait (%p2875_p9), %s255_s23, 512  }
  0x64   : > { %2291 = vsyncadd (%p2875_p9), %s255_s23, 4294966784  ;;  %p2876_p0 = scmp.eq.s32.totalorder %s2437_s26, 0 }
  0x66   : > { %2293 = dma.done.wait (%p2876_p0), [#allocation6], 24576   ;;  %p2877_p6 = pmov %p2876_p0 }
  0x67   : > { %v308_v0 = vld [vmem:[#allocation5 + $0x8] sm:$0xff]  ;;  %v314_v1 = vld [vmem:[#allocation5 + $0x38] sm:$0xff]  ;;  %v307_v5 = vld [vmem:[#allocation5] sm:$0xff]  ;;  %s1475_s28 = sand.u32 1, %s2437_s26   ;;  %s2668_s30 = scalar_lea.vmem [#allocation7], %s2567_s13 }
  0x68   : > { %2295 = vsyncadd (%p2877_p6), [#allocation6], 4294942720  ;;  %v310_v2 = vld [vmem:[#allocation5 + $0x18] sm:$0xff]  ;;  %v1829_v3 = vpack.c.bf16 %v314_v1, %v308_v0  ;;  %v316_v4 = vld [vmem:[#allocation5 + $0x48] sm:$0xff]  ;;  %s2674_s14 = scalar_lea.vmem [#allocation8], %s2567_s13  ;;  %s2739_s27 = scalar_lea.vmem [#allocation10], %s2567_s13 }
  0x69   : > { %v313_v6 = vld [vmem:[#allocation5 + $0x30] sm:$0xff]  ;;  %v1893_v7 = vpack.c.bf16 %v316_v4, %v310_v2  ;;  %v315_v10 = vld [vmem:[#allocation5 + $0x40] sm:$0xff]  ;;  %v320_v11 = vld [vmem:[#allocation5 + $0x68] sm:$0xff]  ;;  %s1471_s18 = scalar_lea.sflag [#allocation4], %s2564_s29  ;;  %s2748_s7 = scalar_lea.sflag [#allocation9], %s1475_s28 }
  0x6a   : > { %v1831_v8 = vpack.c.bf16 %v313_v6, %v307_v5  ;;  %v309_v9 = vld [vmem:[#allocation5 + $0x10] sm:$0xff]  ;;  %1830 = vmatprep.subr.bf16.mxu0 %v1829_v3  ;;  %v326_v13 = vld [vmem:[#allocation5 + $0x98] sm:$0xff]  ;;  %v328_v15 = vld [vmem:[#allocation5 + $0xa8] sm:$0xff] }
  0x6b   : > { %v1895_v12 = vpack.c.bf16 %v315_v10, %v309_v9  ;;  %v322_v14 = vld [vmem:[#allocation5 + $0x78] sm:$0xff]  ;;  %1894 = vmatprep.subr.bf16.mxu1 %v1893_v7  ;;  %v1833_v16 = vpack.c.bf16 %v326_v13, %v320_v11  ;;  %v319_v18 = vld [vmem:[#allocation5 + $0x60] sm:$0xff]  ;;  %v325_v19 = vld [vmem:[#allocation5 + $0x90] sm:$0xff] }
  0x6c   : > { %1832 = vmatpush1.bf16.msra.mxu0 %v1831_v8  ;;  %v1897_v17 = vpack.c.bf16 %v328_v15, %v322_v14  ;;  %v321_v20 = vld [vmem:[#allocation5 + $0x70] sm:$0xff]  ;;  %v1835_v21 = vpack.c.bf16 %v325_v19, %v319_v18  ;;  %v327_v22 = vld [vmem:[#allocation5 + $0xa0] sm:$0xff]  ;;  %v332_v23 = vld [vmem:[#allocation5 + $0xc8] sm:$0xff] }
  0x6d   : > { %1896 = vmatpush1.bf16.msra.mxu1 %v1895_v12  ;;  %v338_v24 = vld [vmem:[#allocation5 + $0xf8] sm:$0xff]  ;;  %1834 = vmatprep.subr.bf16.mxu0 %v1833_v16  ;;  %v1899_v25 = vpack.c.bf16 %v327_v22, %v321_v20  ;;  %v340_v28 = vld [vmem:[#allocation5 + $0x108] sm:$0xff]  ;;  %v331_v29 = vld [vmem:[#allocation5 + $0xc0] sm:$0xff] }
  0x6e   : > { %1898 = vmatprep.subr.bf16.mxu1 %v1897_v17  ;;  %v1837_v26 = vpack.c.bf16 %v338_v24, %v332_v23  ;;  %v334_v27 = vld [vmem:[#allocation5 + $0xd8] sm:$0xff]  ;;  %v337_v31 = vld [vmem:[#allocation5 + $0xf0] sm:$0xff]  ;;  %v339_v33 = vld [vmem:[#allocation5 + $0x100] sm:$0xff] }
  0x6f   : > { %v1901_v30 = vpack.c.bf16 %v340_v28, %v334_v27  ;;  %v333_v32 = vld [vmem:[#allocation5 + $0xd0] sm:$0xff]  ;;  %v1839_v34 = vpack.c.bf16 %v337_v31, %v331_v29  ;;  %v344_v35 = vld [vmem:[#allocation5 + $0x128] sm:$0xff]  ;;  %v350_v36 = vld [vmem:[#allocation5 + $0x158] sm:$0xff] }
  0x70   : > { %1836 = vmatpush1.bf16.msra.mxu0 %v1835_v21  ;;  %v346_v37 = vld [vmem:[#allocation5 + $0x138] sm:$0xff]  ;;  %v1903_v38 = vpack.c.bf16 %v339_v33, %v333_v32  ;;  %v1841_v39 = vpack.c.bf16 %v350_v36, %v344_v35  ;;  %v352_v40 = vld [vmem:[#allocation5 + $0x168] sm:$0xff]  ;;  %v343_v41 = vld [vmem:[#allocation5 + $0x120] sm:$0xff] }
  0x71   : > { %1900 = vmatpush1.bf16.msra.mxu1 %v1899_v25  ;;  %1838 = vmatprep.subr.bf16.mxu0 %v1837_v26  ;;  %v349_v42 = vld [vmem:[#allocation5 + $0x150] sm:$0xff]  ;;  %v1905_v43 = vpack.c.bf16 %v352_v40, %v346_v37  ;;  %v351_v45 = vld [vmem:[#allocation5 + $0x160] sm:$0xff]  ;;  %v356_v46 = vld [vmem:[#allocation5 + $0x188] sm:$0xff] }
  0x72   : > { %1902 = vmatprep.subr.bf16.mxu1 %v1901_v30  ;;  %v345_v44 = vld [vmem:[#allocation5 + $0x130] sm:$0xff]  ;;  %v362_v47 = vld [vmem:[#allocation5 + $0x1b8] sm:$0xff]  ;;  %v364_v49 = vld [vmem:[#allocation5 + $0x1c8] sm:$0xff]  ;;  %v1843_v50 = vpack.c.bf16 %v349_v42, %v343_v41 }
  0x73   : > { %v358_v48 = vld [vmem:[#allocation5 + $0x198] sm:$0xff]  ;;  %v1907_v51 = vpack.c.bf16 %v351_v45, %v345_v44  ;;  %v1845_v52 = vpack.c.bf16 %v362_v47, %v356_v46  ;;  %v355_v53 = vld [vmem:[#allocation5 + $0x180] sm:$0xff]  ;;  %v361_v54 = vld [vmem:[#allocation5 + $0x1b0] sm:$0xff] }
  0x74   : > { %1840 = vmatpush1.bf16.msra.mxu0 %v1839_v34  ;;  %v357_v55 = vld [vmem:[#allocation5 + $0x190] sm:$0xff]  ;;  %v1909_v56 = vpack.c.bf16 %v364_v49, %v358_v48  ;;  %v363_v57 = vld [vmem:[#allocation5 + $0x1c0] sm:$0xff]  ;;  %v368_v58 = vld [vmem:[#allocation5 + $0x1e8] sm:$0xff]  ;;  %v1847_v62 = vpack.c.bf16 %v361_v54, %v355_v53 }
  0x75   : > { %1904 = vmatpush1.bf16.msra.mxu1 %v1903_v38  ;;  %1842 = vmatprep.subr.bf16.mxu0 %v1841_v39  ;;  %v374_v59 = vld [vmem:[#allocation5 + $0x218] sm:$0xff]  ;;  %v376_v61 = vld [vmem:[#allocation5 + $0x228] sm:$0xff]  ;;  %v1911_v63 = vpack.c.bf16 %v363_v57, %v357_v55  ;;  %v367_v1 = vld [vmem:[#allocation5 + $0x1e0] sm:$0xff] }
  0x76   : > { %1906 = vmatprep.subr.bf16.mxu1 %v1905_v43  ;;  %v370_v60 = vld [vmem:[#allocation5 + $0x1f8] sm:$0xff]  ;;  %v1849_v0 = vpack.c.bf16 %v374_v59, %v368_v58  ;;  %v373_v2 = vld [vmem:[#allocation5 + $0x210] sm:$0xff]  ;;  %v375_v5 = vld [vmem:[#allocation5 + $0x220] sm:$0xff] }
  0x77   : > { %v369_v3 = vld [vmem:[#allocation5 + $0x1f0] sm:$0xff]  ;;  %v1913_v4 = vpack.c.bf16 %v376_v61, %v370_v60  ;;  %v380_v6 = vld [vmem:[#allocation5 + $0x248] sm:$0xff]  ;;  %v386_v7 = vld [vmem:[#allocation5 + $0x278] sm:$0xff]  ;;  %v1851_v10 = vpack.c.bf16 %v373_v2, %v367_v1 }
  0x78   : > { %1844 = vmatpush1.bf16.msra.mxu0 %v1843_v50  ;;  %v382_v8 = vld [vmem:[#allocation5 + $0x258] sm:$0xff]  ;;  %v388_v9 = vld [vmem:[#allocation5 + $0x288] sm:$0xff]  ;;  %v1915_v11 = vpack.c.bf16 %v375_v5, %v369_v3  ;;  %v1853_v12 = vpack.c.bf16 %v386_v7, %v380_v6  ;;  %v379_v13 = vld [vmem:[#allocation5 + $0x240] sm:$0xff] }
  0x79   : > { %1908 = vmatpush1.bf16.msra.mxu1 %v1907_v51  ;;  %1846 = vmatprep.subr.bf16.mxu0 %v1845_v52  ;;  %v385_v14 = vld [vmem:[#allocation5 + $0x270] sm:$0xff]  ;;  %v1917_v16 = vpack.c.bf16 %v388_v9, %v382_v8  ;;  %v387_v17 = vld [vmem:[#allocation5 + $0x280] sm:$0xff]  ;;  %v392_v18 = vld [vmem:[#allocation5 + $0x2a8] sm:$0xff] }
  0x7a   : > { %1910 = vmatprep.subr.bf16.mxu1 %v1909_v56  ;;  %v381_v15 = vld [vmem:[#allocation5 + $0x250] sm:$0xff]  ;;  %v398_v19 = vld [vmem:[#allocation5 + $0x2d8] sm:$0xff]  ;;  %v400_v21 = vld [vmem:[#allocation5 + $0x2e8] sm:$0xff]  ;;  %v1855_v22 = vpack.c.bf16 %v385_v14, %v379_v13 }
  0x7b   : > { %v394_v20 = vld [vmem:[#allocation5 + $0x2b8] sm:$0xff]  ;;  %v1919_v23 = vpack.c.bf16 %v387_v17, %v381_v15  ;;  %v1857_v24 = vpack.c.bf16 %v398_v19, %v392_v18  ;;  %v391_v25 = vld [vmem:[#allocation5 + $0x2a0] sm:$0xff]  ;;  %v397_v26 = vld [vmem:[#allocation5 + $0x2d0] sm:$0xff] }
  0x7c   : > { %1848 = vmatpush1.bf16.msra.mxu0 %v1847_v62  ;;  %v393_v27 = vld [vmem:[#allocation5 + $0x2b0] sm:$0xff]  ;;  %v1921_v28 = vpack.c.bf16 %v400_v21, %v394_v20  ;;  %v399_v29 = vld [vmem:[#allocation5 + $0x2e0] sm:$0xff]  ;;  %v404_v30 = vld [vmem:[#allocation5 + $0x308] sm:$0xff]  ;;  %v1859_v34 = vpack.c.bf16 %v397_v26, %v391_v25 }
  0x7d   : > { %1912 = vmatpush1.bf16.msra.mxu1 %v1911_v63  ;;  %1850 = vmatprep.subr.bf16.mxu0 %v1849_v0  ;;  %v410_v31 = vld [vmem:[#allocation5 + $0x338] sm:$0xff]  ;;  %v412_v33 = vld [vmem:[#allocation5 + $0x348] sm:$0xff]  ;;  %v1923_v35 = vpack.c.bf16 %v399_v29, %v393_v27  ;;  %v403_v37 = vld [vmem:[#allocation5 + $0x300] sm:$0xff] }
  0x7e   : > { %1914 = vmatprep.subr.bf16.mxu1 %v1913_v4  ;;  %v406_v32 = vld [vmem:[#allocation5 + $0x318] sm:$0xff]  ;;  %v1861_v36 = vpack.c.bf16 %v410_v31, %v404_v30  ;;  %v409_v38 = vld [vmem:[#allocation5 + $0x330] sm:$0xff]  ;;  %v411_v41 = vld [vmem:[#allocation5 + $0x340] sm:$0xff] }
  0x7f   : > { %v405_v39 = vld [vmem:[#allocation5 + $0x310] sm:$0xff]  ;;  %v1925_v40 = vpack.c.bf16 %v412_v33, %v406_v32  ;;  %v416_v42 = vld [vmem:[#allocation5 + $0x368] sm:$0xff]  ;;  %v422_v43 = vld [vmem:[#allocation5 + $0x398] sm:$0xff]  ;;  %v1863_v46 = vpack.c.bf16 %v409_v38, %v403_v37 }
  0x80   : > { %1852 = vmatpush1.bf16.msra.mxu0 %v1851_v10  ;;  %v418_v44 = vld [vmem:[#allocation5 + $0x378] sm:$0xff]  ;;  %v424_v45 = vld [vmem:[#allocation5 + $0x3a8] sm:$0xff]  ;;  %v1927_v47 = vpack.c.bf16 %v411_v41, %v405_v39  ;;  %v1865_v48 = vpack.c.bf16 %v422_v43, %v416_v42  ;;  %v415_v49 = vld [vmem:[#allocation5 + $0x360] sm:$0xff] }
  0x81   : > { %1916 = vmatpush1.bf16.msra.mxu1 %v1915_v11  ;;  %1854 = vmatprep.subr.bf16.mxu0 %v1853_v12  ;;  %v421_v50 = vld [vmem:[#allocation5 + $0x390] sm:$0xff]  ;;  %v1929_v52 = vpack.c.bf16 %v424_v45, %v418_v44  ;;  %v423_v53 = vld [vmem:[#allocation5 + $0x3a0] sm:$0xff]  ;;  %v428_v54 = vld [vmem:[#allocation5 + $0x3c8] sm:$0xff] }
  0x82   : > { %1918 = vmatprep.subr.bf16.mxu1 %v1917_v16  ;;  %v417_v51 = vld [vmem:[#allocation5 + $0x370] sm:$0xff]  ;;  %v434_v55 = vld [vmem:[#allocation5 + $0x3f8] sm:$0xff]  ;;  %v436_v57 = vld [vmem:[#allocation5 + $0x408] sm:$0xff]  ;;  %v1867_v58 = vpack.c.bf16 %v421_v50, %v415_v49 }
  0x83   : > { %v430_v56 = vld [vmem:[#allocation5 + $0x3d8] sm:$0xff]  ;;  %v1931_v59 = vpack.c.bf16 %v423_v53, %v417_v51  ;;  %v1869_v60 = vpack.c.bf16 %v434_v55, %v428_v54  ;;  %v427_v61 = vld [vmem:[#allocation5 + $0x3c0] sm:$0xff]  ;;  %v433_v62 = vld [vmem:[#allocation5 + $0x3f0] sm:$0xff] }
  0x84   : > { %1856 = vmatpush1.bf16.msra.mxu0 %v1855_v22  ;;  %v429_v63 = vld [vmem:[#allocation5 + $0x3d0] sm:$0xff]  ;;  %v1933_v0 = vpack.c.bf16 %v436_v57, %v430_v56  ;;  %v435_v1 = vld [vmem:[#allocation5 + $0x400] sm:$0xff]  ;;  %v440_v2 = vld [vmem:[#allocation5 + $0x428] sm:$0xff]  ;;  %v1871_v6 = vpack.c.bf16 %v433_v62, %v427_v61 }
  0x85   : > { %1920 = vmatpush1.bf16.msra.mxu1 %v1919_v23  ;;  %1858 = vmatprep.subr.bf16.mxu0 %v1857_v24  ;;  %v446_v3 = vld [vmem:[#allocation5 + $0x458] sm:$0xff]  ;;  %v448_v5 = vld [vmem:[#allocation5 + $0x468] sm:$0xff]  ;;  %v439_v7 = vld [vmem:[#allocation5 + $0x420] sm:$0xff]  ;;  %v1935_v8 = vpack.c.bf16 %v435_v1, %v429_v63 }
  0x86   : > { %1922 = vmatprep.subr.bf16.mxu1 %v1921_v28  ;;  %v442_v4 = vld [vmem:[#allocation5 + $0x438] sm:$0xff]  ;;  %v1873_v9 = vpack.c.bf16 %v446_v3, %v440_v2  ;;  %v445_v10 = vld [vmem:[#allocation5 + $0x450] sm:$0xff]  ;;  %v447_v12 = vld [vmem:[#allocation5 + $0x460] sm:$0xff] }
  0x87   : > { %v441_v11 = vld [vmem:[#allocation5 + $0x430] sm:$0xff]  ;;  %v1937_v13 = vpack.c.bf16 %v448_v5, %v442_v4  ;;  %v452_v14 = vld [vmem:[#allocation5 + $0x488] sm:$0xff]  ;;  %v458_v15 = vld [vmem:[#allocation5 + $0x4b8] sm:$0xff]  ;;  %v1875_v19 = vpack.c.bf16 %v445_v10, %v439_v7 }
  0x88   : > { %1860 = vmatpush1.bf16.msra.mxu0 %v1859_v34  ;;  %v2582_v16 = vld [vmem:[%s2571_s12 + $0x8] sm:$0xff]  ;;  %v454_v17 = vld [vmem:[#allocation5 + $0x498] sm:$0xff]  ;;  %v1939_v20 = vpack.c.bf16 %v447_v12, %v441_v11  ;;  %v1877_v21 = vpack.c.bf16 %v458_v15, %v452_v14  ;;  %v451_v22 = vld [vmem:[#allocation5 + $0x480] sm:$0xff] }
  0x89   : > { %1924 = vmatpush1.bf16.msra.mxu1 %v1923_v35  ;;  %1862 = vmatprep.subr.bf16.mxu0 %v1861_v36  ;;  %v460_v18 = vld [vmem:[#allocation5 + $0x4c8] sm:$0xff]  ;;  %v457_v23 = vld [vmem:[#allocation5 + $0x4b0] sm:$0xff]  ;;  %v459_v26 = vld [vmem:[#allocation5 + $0x4c0] sm:$0xff] }
  0x8a   : > { %1926 = vmatprep.subr.bf16.mxu1 %v1925_v40  ;;  %595 = vmatprep.mubr.f32.mxu0 %v2582_v16  ;;  %v453_v24 = vld [vmem:[#allocation5 + $0x490] sm:$0xff]  ;;  %v1941_v25 = vpack.c.bf16 %v460_v18, %v454_v17  ;;  %v464_v27 = vld [vmem:[#allocation5 + $0x4e8] sm:$0xff]  ;;  %v470_v28 = vld [vmem:[#allocation5 + $0x518] sm:$0xff]  ;;  %v1879_v31 = vpack.c.bf16 %v457_v23, %v451_v22 }
  0x8b   : > { %672 = vmatprep.mubr.f32.mxu1 %v2582_v16  ;;  %v466_v29 = vld [vmem:[#allocation5 + $0x4f8] sm:$0xff]  ;;  %v472_v30 = vld [vmem:[#allocation5 + $0x528] sm:$0xff]  ;;  %v1943_v32 = vpack.c.bf16 %v459_v26, %v453_v24  ;;  %v1881_v33 = vpack.c.bf16 %v470_v28, %v464_v27  ;;  %v463_v34 = vld [vmem:[#allocation5 + $0x4e0] sm:$0xff] }
  0x8c   : > { %1864 = vmatpush1.bf16.msra.mxu0 %v1863_v46  ;;  %v469_v35 = vld [vmem:[#allocation5 + $0x510] sm:$0xff]  ;;  %v1945_v37 = vpack.c.bf16 %v472_v30, %v466_v29  ;;  %v471_v38 = vld [vmem:[#allocation5 + $0x520] sm:$0xff]  ;;  %v476_v39 = vld [vmem:[#allocation5 + $0x548] sm:$0xff] }
  0x8d   : > { %1928 = vmatpush1.bf16.msra.mxu1 %v1927_v47  ;;  %1866 = vmatprep.subr.bf16.mxu0 %v1865_v48  ;;  %v465_v36 = vld [vmem:[#allocation5 + $0x4f0] sm:$0xff]  ;;  %v482_v40 = vld [vmem:[#allocation5 + $0x578] sm:$0xff]  ;;  %v484_v42 = vld [vmem:[#allocation5 + $0x588] sm:$0xff]  ;;  %v1883_v43 = vpack.c.bf16 %v469_v35, %v463_v34 }
  0x8e   : > { %1930 = vmatprep.subr.bf16.mxu1 %v1929_v52  ;;  %v478_v41 = vld [vmem:[#allocation5 + $0x558] sm:$0xff]  ;;  %v1947_v44 = vpack.c.bf16 %v471_v38, %v465_v36  ;;  %v1885_v45 = vpack.c.bf16 %v482_v40, %v476_v39  ;;  %v475_v46 = vld [vmem:[#allocation5 + $0x540] sm:$0xff]  ;;  %v481_v47 = vld [vmem:[#allocation5 + $0x570] sm:$0xff] }
  0x8f   : > { %v477_v48 = vld [vmem:[#allocation5 + $0x550] sm:$0xff]  ;;  %v1949_v49 = vpack.c.bf16 %v484_v42, %v478_v41  ;;  %v483_v50 = vld [vmem:[#allocation5 + $0x580] sm:$0xff]  ;;  %v488_v51 = vld [vmem:[#allocation5 + $0x5a8] sm:$0xff]  ;;  %v1887_v55 = vpack.c.bf16 %v481_v47, %v475_v46 }
  0x90   : > { %1868 = vmatpush1.bf16.msra.mxu0 %v1867_v58  ;;  %v494_v52 = vld [vmem:[#allocation5 + $0x5d8] sm:$0xff]  ;;  %v496_v54 = vld [vmem:[#allocation5 + $0x5e8] sm:$0xff]  ;;  %v1951_v56 = vpack.c.bf16 %v483_v50, %v477_v48  ;;  %v487_v58 = vld [vmem:[#allocation5 + $0x5a0] sm:$0xff] }
  0x91   : > { %1932 = vmatpush1.bf16.msra.mxu1 %v1931_v59  ;;  %1870 = vmatprep.subr.bf16.mxu0 %v1869_v60  ;;  %v490_v53 = vld [vmem:[#allocation5 + $0x5b8] sm:$0xff]  ;;  %v1889_v57 = vpack.c.bf16 %v494_v52, %v488_v51  ;;  %v493_v59 = vld [vmem:[#allocation5 + $0x5d0] sm:$0xff]  ;;  %v495_v62 = vld [vmem:[#allocation5 + $0x5e0] sm:$0xff] }
  0x92   : > { %1934 = vmatprep.subr.bf16.mxu1 %v1933_v0  ;;  %v489_v60 = vld [vmem:[#allocation5 + $0x5b0] sm:$0xff]  ;;  %v1953_v61 = vpack.c.bf16 %v496_v54, %v490_v53  ;;  %v312_v63 = vld [vmem:[#allocation5 + $0x28] sm:$0xff]  ;;  %v318_v0 = vld [vmem:[#allocation5 + $0x58] sm:$0xff]  ;;  %v1891_v1 = vpack.c.bf16 %v493_v59, %v487_v58 }
  0x93   : > { %v1955_v2 = vpack.c.bf16 %v495_v62, %v489_v60  ;;  %v1957_v3 = vpack.c.bf16 %v318_v0, %v312_v63  ;;  %v311_v4 = vld [vmem:[#allocation5 + $0x20] sm:$0xff]  ;;  %v317_v5 = vld [vmem:[#allocation5 + $0x50] sm:$0xff]  ;;  %v330_v7 = vld [vmem:[#allocation5 + $0xb8] sm:$0xff] }
  0x94   : > { %1872 = vmatpush1.bf16.msra.mxu0 %v1871_v6  ;;  %v324_v6 = vld [vmem:[#allocation5 + $0x88] sm:$0xff]  ;;  %v323_v11 = vld [vmem:[#allocation5 + $0x80] sm:$0xff]  ;;  %v329_v12 = vld [vmem:[#allocation5 + $0xb0] sm:$0xff] }
  0x95   : > { %1936 = vmatpush1.bf16.msra.mxu1 %v1935_v8  ;;  %1874 = vmatprep.subr.bf16.mxu0 %v1873_v9  ;;  %v2587_v8 = vld [vmem:[%s2571_s12] sm:$0xff]  ;;  %v1959_v9 = vpack.c.bf16 %v317_v5, %v311_v4  ;;  %v1961_v10 = vpack.c.bf16 %v330_v7, %v324_v6  ;;  %v342_v14 = vld [vmem:[#allocation5 + $0x118] sm:$0xff]  ;;  %v1963_v17 = vpack.c.bf16 %v329_v12, %v323_v11  ;;  %v2593_v18 = vld [vmem:[%s2571_s12 + $0x10] sm:$0xff] }
  0x96   : > { %1938 = vmatprep.subr.bf16.mxu1 %v1937_v13  ;;  %v336_v13 = vld [vmem:[#allocation5 + $0xe8] sm:$0xff]  ;;  %v306_v15 = vld [vmem:[%s2571_s12 + $0x18] sm:$0xff]  ;;  %v347_v26 = vld [vmem:[#allocation5 + $0x140] sm:$0xff] }
  0x97   : > { %v348_v22 = vld [vmem:[#allocation5 + $0x148] sm:$0xff]  ;;  %v354_v23 = vld [vmem:[#allocation5 + $0x178] sm:$0xff]  ;;  %v353_v27 = vld [vmem:[#allocation5 + $0x170] sm:$0xff] }
  0x98   : > { %1876 = vmatpush1.bf16.msra.mxu0 %v1875_v19  ;;  %v1965_v19 = vpack.c.bf16 %v342_v14, %v336_v13  ;;  %v360_v28 = vld [vmem:[#allocation5 + $0x1a8] sm:$0xff]  ;;  %v366_v29 = vld [vmem:[#allocation5 + $0x1d8] sm:$0xff]  ;;  %v1971_v30 = vpack.c.bf16 %v353_v27, %v347_v26  ;;  %v371_v38 = vld [vmem:[#allocation5 + $0x200] sm:$0xff] }
  0x99   : > { %1940 = vmatpush1.bf16.msra.mxu1 %v1939_v20  ;;  %1878 = vmatprep.subr.bf16.mxu0 %v1877_v21  ;;  %v335_v20 = vld [vmem:[#allocation5 + $0xe0] sm:$0xff]  ;;  %v341_v21 = vld [vmem:[#allocation5 + $0x110] sm:$0xff]  ;;  %v372_v34 = vld [vmem:[#allocation5 + $0x208] sm:$0xff] }
  0x9a   : > { %1942 = vmatprep.subr.bf16.mxu1 %v1941_v25  ;;  %v1967_v24 = vpack.c.bf16 %v341_v21, %v335_v20  ;;  %v1969_v25 = vpack.c.bf16 %v354_v23, %v348_v22  ;;  %v378_v35 = vld [vmem:[#allocation5 + $0x238] sm:$0xff]  ;;  %v377_v39 = vld [vmem:[#allocation5 + $0x230] sm:$0xff]  ;;  %v408_v51 = vld [vmem:[#allocation5 + $0x328] sm:$0xff] }
  0x9b   : > { %v390_v40 = vld [vmem:[#allocation5 + $0x298] sm:$0xff]  ;;  %v1979_v41 = vpack.c.bf16 %v377_v39, %v371_v38  ;;  %v401_v50 = vld [vmem:[#allocation5 + $0x2f0] sm:$0xff]  ;;  %v432_v63 = vld [vmem:[#allocation5 + $0x3e8] sm:$0xff]  ;;  %v501_v39 = vlaneseq }
  0x9c   : > { %1880 = vmatpush1.bf16.msra.mxu0 %v1879_v31  ;;  %v1973_v31 = vpack.c.bf16 %v366_v29, %v360_v28  ;;  %v402_v46 = vld [vmem:[#allocation5 + $0x2f8] sm:$0xff]  ;;  %v425_v62 = vld [vmem:[#allocation5 + $0x3b0] sm:$0xff]  ;;  %v444_v5 = vld [vmem:[#allocation5 + $0x448] sm:$0xff] }
  0x9d   : > { %1944 = vmatpush1.bf16.msra.mxu1 %v1943_v32  ;;  %1882 = vmatprep.subr.bf16.mxu0 %v1881_v33  ;;  %v359_v32 = vld [vmem:[#allocation5 + $0x1a0] sm:$0xff]  ;;  %v365_v33 = vld [vmem:[#allocation5 + $0x1d0] sm:$0xff]  ;;  %v414_v52 = vld [vmem:[#allocation5 + $0x358] sm:$0xff] }
  0x9e   : > { %1946 = vmatprep.subr.bf16.mxu1 %v1945_v37  ;;  %v1975_v36 = vpack.c.bf16 %v365_v33, %v359_v32  ;;  %v1977_v37 = vpack.c.bf16 %v378_v35, %v372_v34  ;;  %v1989_v54 = vpack.c.bf16 %v414_v52, %v408_v51  ;;  %v426_v58 = vld [vmem:[#allocation5 + $0x3b8] sm:$0xff]  ;;  %v437_v4 = vld [vmem:[#allocation5 + $0x410] sm:$0xff]  ;;  %v456_v12 = vld [vmem:[#allocation5 + $0x4a8] sm:$0xff] }
  0x9f   : > { %v438_v0 = vld [vmem:[#allocation5 + $0x418] sm:$0xff]  ;;  %v449_v11 = vld [vmem:[#allocation5 + $0x470] sm:$0xff]  ;;  %v468_v20 = vld [vmem:[#allocation5 + $0x508] sm:$0xff] }
  0xa0   : > { %1884 = vmatpush1.bf16.msra.mxu0 %v1883_v43  ;;  %v383_v43 = vld [vmem:[#allocation5 + $0x260] sm:$0xff]  ;;  %v450_v6 = vld [vmem:[#allocation5 + $0x478] sm:$0xff]  ;;  %v480_v26 = vld [vmem:[#allocation5 + $0x568] sm:$0xff] }
  0xa1   : > { %1948 = vmatpush1.bf16.msra.mxu1 %v1947_v44  ;;  %1886 = vmatprep.subr.bf16.mxu0 %v1885_v45  ;;  %v389_v44 = vld [vmem:[#allocation5 + $0x290] sm:$0xff]  ;;  %v396_v45 = vld [vmem:[#allocation5 + $0x2c8] sm:$0xff]  ;;  %v462_v13 = vld [vmem:[#allocation5 + $0x4d8] sm:$0xff] }
  0xa2   : > { %1950 = vmatprep.subr.bf16.mxu1 %v1949_v49  ;;  %v1983_v47 = vpack.c.bf16 %v389_v44, %v383_v43  ;;  %v1985_v48 = vpack.c.bf16 %v402_v46, %v396_v45  ;;  %v395_v49 = vld [vmem:[#allocation5 + $0x2c0] sm:$0xff]  ;;  %v474_v21 = vld [vmem:[#allocation5 + $0x538] sm:$0xff]  ;;  %v492_v32 = vld [vmem:[#allocation5 + $0x5c8] sm:$0xff]  ;;  %v2342_v45 = vmov 1983009808  }
  0xa3   : > { %v1987_v53 = vpack.c.bf16 %v401_v50, %v395_v49  ;;  %v2009_v23 = vpack.c.bf16 %v474_v21, %v468_v20  ;;  %v486_v27 = vld [vmem:[#allocation5 + $0x598] sm:$0xff]  ;;  %v764_v46 = vunpack.c.l.s4 %v2342_v45 }
  0xa4   : > { %1888 = vmatpush1.bf16.msra.mxu0 %v1887_v55  ;;  %v407_v55 = vld [vmem:[#allocation5 + $0x320] sm:$0xff]  ;;  %v2013_v29 = vpack.c.bf16 %v486_v27, %v480_v26  ;;  %v498_v33 = vld [vmem:[#allocation5 + $0x5f8] sm:$0xff] }
  0xa5   : > { %1952 = vmatpush1.bf16.msra.mxu1 %v1951_v56  ;;  %1890 = vmatprep.subr.bf16.mxu0 %v1889_v57  ;;  %v413_v56 = vld [vmem:[#allocation5 + $0x350] sm:$0xff]  ;;  %v420_v57 = vld [vmem:[#allocation5 + $0x388] sm:$0xff]  ;;  %v2017_v35 = vpack.c.bf16 %v498_v33, %v492_v32  ;;  %v765_v49 = vunpack.c.0.s8 %v764_v46 }
  0xa6   : > { %1954 = vmatprep.subr.bf16.mxu1 %v1953_v61  ;;  %v1991_v59 = vpack.c.bf16 %v413_v56, %v407_v55  ;;  %v1993_v60 = vpack.c.bf16 %v426_v58, %v420_v57  ;;  %v419_v61 = vld [vmem:[#allocation5 + $0x380] sm:$0xff] }
  0xa8   : > { %1892 = vmatpush1.bf16.msra.mxu0 %v1891_v1  ;;  %v1995_v1 = vpack.c.bf16 %v425_v62, %v419_v61 }
  0xa9   : > { %1956 = vmatpush1.bf16.msra.mxu1 %v1955_v2  ;;  %1958 = vmatprep.subr.bf16.mxu0 %v1957_v3  ;;  %v1997_v2 = vpack.c.bf16 %v438_v0, %v432_v63 }
  0xaa   : > { %2021 = vmatprep.subr.bf16.mxu1 %v1957_v3  ;;  %v431_v3 = vld [vmem:[#allocation5 + $0x3e0] sm:$0xff] }
  0xab   : > { %596 = vmatmul.mubr.f32.vlgmr.msra.gmra.mrb[0].mxu0 %v2587_v8  ;;  %v1999_v7 = vpack.c.bf16 %v437_v4, %v431_v3 }
  0xac   : > { %673 = vmatmul.mubr.f32.vlgmr.msra.gmra.mrb[0].mxu1 %v2587_v8  ;;  %1960 = vmatpush1.bf16.msra.mxu0 %v1959_v9 }
  0xad   : > { %2037 = vmatpush1.bf16.msra.mxu1 %v1959_v9  ;;  %1962 = vmatprep.subr.bf16.mxu0 %v1961_v10  ;;  %v2001_v9 = vpack.c.bf16 %v450_v6, %v444_v5 }
  0xae   : > { %2022 = vmatprep.subr.bf16.mxu1 %v1961_v10  ;;  %601 = vmatprep.mubr.f32.mxu0 %v306_v15  ;;  %v443_v10 = vld [vmem:[#allocation5 + $0x440] sm:$0xff] }
  0xaf   : > { %678 = vmatprep.mubr.f32.mxu1 %v306_v15  ;;  %602 = vmatmul.mubr.f32.gmra.mrb[2].mxu0 %v2593_v18  ;;  %v2003_v14 = vpack.c.bf16 %v449_v11, %v443_v10 }
  0xb0   : > { %1964 = vmatpush1.bf16.msra.mxu0 %v1963_v17  ;;  %679 = vmatmul.mubr.f32.gmra.mrb[2].mxu1 %v2593_v18 }
  0xb1   : > { %2038 = vmatpush1.bf16.msra.mxu1 %v1963_v17  ;;  %1966 = vmatprep.subr.bf16.mxu0 %v1965_v19  ;;  %v455_v17 = vld [vmem:[#allocation5 + $0x4a0] sm:$0xff] }
  0xb2   : > { %2023 = vmatprep.subr.bf16.mxu1 %v1965_v19  ;;  %749 = vmatprep.mubr.f32.mxu0 %v2582_v16  ;;  %v384_v16 = vld [vmem:[#allocation5 + $0x268] sm:$0xff]  ;;  %v461_v19 = vld [vmem:[#allocation5 + $0x4d0] sm:$0xff] }
  0xb3   : > { %755 = vmatprep.mubr.f32.mxu1 %v306_v15  ;;  %v1981_v42 = vpack.c.bf16 %v390_v40, %v384_v16  ;;  %v2005_v15 = vpack.c.bf16 %v462_v13, %v456_v12  ;;  %v2007_v22 = vpack.c.bf16 %v461_v19, %v455_v17  ;;  %v502_v16 = vshrl.u32 %v501_v39, 7 }
  0xb4   : > { %1968 = vmatpush1.bf16.msra.mxu0 %v1967_v24 }
  0xb5   : > { %2039 = vmatpush1.bf16.msra.mxu1 %v1967_v24  ;;  %1970 = vmatprep.subr.bf16.mxu0 %v1969_v25  ;;  %v467_v24 = vld [vmem:[#allocation5 + $0x500] sm:$0xff]  ;;  %v519_v40 = vsub.s32 4, %v502_v16  ;;  %v523_v43 = vsub.s32 5, %v502_v16  ;;  %v515_v51 = vsub.s32 3, %v502_v16  ;;  %v2612_v55 = vsub.s32 %v765_v49, %v502_v16 }
  0xb6   : > { %2024 = vmatprep.subr.bf16.mxu1 %v1969_v25  ;;  %v473_v25 = vld [vmem:[#allocation5 + $0x530] sm:$0xff] }
  0xb7   : > { %v2011_v28 = vpack.c.bf16 %v473_v25, %v467_v24 }
  0xb8   : > { %1972 = vmatpush1.bf16.msra.mxu0 %v1971_v30 }
  0xb9   : > { %2040 = vmatpush1.bf16.msra.mxu1 %v1971_v30  ;;  %1974 = vmatprep.subr.bf16.mxu0 %v1973_v31  ;;  %v479_v30 = vld [vmem:[#allocation5 + $0x560] sm:$0xff] }
  0xba   : > { %2025 = vmatprep.subr.bf16.mxu1 %v1973_v31  ;;  %v485_v31 = vld [vmem:[#allocation5 + $0x590] sm:$0xff] }
  0xbb   : > { %v2015_v34 = vpack.c.bf16 %v485_v31, %v479_v30 }
  0xbc   : > { %1976 = vmatpush1.bf16.msra.mxu0 %v1975_v36 }
  0xbd   : > { %2041 = vmatpush1.bf16.msra.mxu1 %v1975_v36  ;;  %1978 = vmatprep.subr.bf16.mxu0 %v1977_v37  ;;  %v491_v36 = vld [vmem:[#allocation5 + $0x5c0] sm:$0xff] }
  0xbe   : > { %2026 = vmatprep.subr.bf16.mxu1 %v1977_v37  ;;  %v497_v37 = vld [vmem:[#allocation5 + $0x5f0] sm:$0xff] }
  0xbf   : > { %v2019_v38 = vpack.c.bf16 %v497_v37, %v491_v36 }
  0xc0   : > { %1980 = vmatpush1.bf16.msra.mxu0 %v1979_v41 }
  0xc1   : > { %2042 = vmatpush1.bf16.msra.mxu1 %v1979_v41  ;;  %1982 = vmatprep.subr.bf16.mxu0 %v1981_v42  ;;  %v499_v41 = vld [vmem:[%s2845_s2] sm:$0x3f] }
  0xc2   : > { %2027 = vmatprep.subr.bf16.mxu1 %v1981_v42  ;;  %v2603_v42 = vrot.slane %v499_v41, %v519_v40  ;;  %v2605_v44 = vrot.slane %v499_v41, %v523_v43  ;;  %v2614_v57 = vrot.slane %v499_v41, %v515_v51 }
  0xc4   : > { %1984 = vmatpush1.bf16.msra.mxu0 %v1983_v47 }
  0xc5   : > { %2043 = vmatpush1.bf16.msra.mxu1 %v1983_v47  ;;  %1986 = vmatprep.subr.bf16.mxu0 %v1985_v48  ;;  %v503_v47 = vsub.s32 0, %v502_v16 }
  0xc6   : > { %2028 = vmatprep.subr.bf16.mxu1 %v1985_v48  ;;  %v511_v48 = vsub.s32 2, %v502_v16 }
  0xc7   : > { %v504_v52 = vrot.slane %v499_v41, %v503_v47 }
  0xc8   : > { %1988 = vmatpush1.bf16.msra.mxu0 %v1987_v53 }
  0xc9   : > { %2044 = vmatpush1.bf16.msra.mxu1 %v1987_v53  ;;  %1990 = vmatprep.subr.bf16.mxu0 %v1989_v54  ;;  %v2608_v53 = vrot.slane %v499_v41, %v511_v48 }
  0xca   : > { %2029 = vmatprep.subr.bf16.mxu1 %v1989_v54 }
  0xcc   : > { %1992 = vmatpush1.bf16.msra.mxu0 %v1991_v59 }
  0xcd   : > { %2045 = vmatpush1.bf16.msra.mxu1 %v1991_v59  ;;  %1994 = vmatprep.subr.bf16.mxu0 %v1993_v60 }
  0xce   : > { %2030 = vmatprep.subr.bf16.mxu1 %v1993_v60 }
  0xd0   : > { %1996 = vmatpush1.bf16.msra.mxu0 %v1995_v1 }
  0xd1   : > { %2046 = vmatpush1.bf16.msra.mxu1 %v1995_v1  ;;  %1998 = vmatprep.subr.bf16.mxu0 %v1997_v2  ;;  %v2344_v1 = vmov 0.0  }
  0xd2   : > { %2031 = vmatprep.subr.bf16.mxu1 %v1997_v2 }
  0xd4   : > { %2000 = vmatpush1.bf16.msra.mxu0 %v1999_v7 }
  0xd5   : > { %2047 = vmatpush1.bf16.msra.mxu1 %v1999_v7  ;;  %2002 = vmatprep.subr.bf16.mxu0 %v2001_v9 }
  0xd6   : > { %2032 = vmatprep.subr.bf16.mxu1 %v2001_v9 }
  0xd8   : > { %2004 = vmatpush1.bf16.msra.mxu0 %v2003_v14 }
  0xd9   : > { %2048 = vmatpush1.bf16.msra.mxu1 %v2003_v14  ;;  %2006 = vmatprep.subr.bf16.mxu0 %v2005_v15 }
  0xda   : > { %2033 = vmatprep.subr.bf16.mxu1 %v2005_v15 }
  0xdc   : > { %2008 = vmatpush1.bf16.msra.mxu0 %v2007_v22 }
  0xdd   : > { %2049 = vmatpush1.bf16.msra.mxu1 %v2007_v22  ;;  %2010 = vmatprep.subr.bf16.mxu0 %v2009_v23 }
  0xde   : > { %2034 = vmatprep.subr.bf16.mxu1 %v2009_v23 }
  0xe0   : > { %2012 = vmatpush1.bf16.msra.mxu0 %v2011_v28 }
  0xe1   : > { %2050 = vmatpush1.bf16.msra.mxu1 %v2011_v28  ;;  %2014 = vmatprep.subr.bf16.mxu0 %v2013_v29 }
  0xe2   : > { %2035 = vmatprep.subr.bf16.mxu1 %v2013_v29 }
  0xe4   : > { %2016 = vmatpush1.bf16.msra.mxu0 %v2015_v34 }
  0xe5   : > { %2051 = vmatpush1.bf16.msra.mxu1 %v2015_v34  ;;  %2018 = vmatprep.subr.bf16.mxu0 %v2017_v35 }
  0xe6   : > { %2036 = vmatprep.subr.bf16.mxu1 %v2017_v35 }
  0xe8   : > { %2020 = vmatpush1.bf16.msra.mxu0 %v2019_v38 }
  0xe9   : > { %2052 = vmatpush1.bf16.msra.mxu1 %v2019_v38 }
  0xeb   : > { %750 = vmatmul.mubr.f32.vlgmr.msra.gmra.mrb[4].mxu0 %v2587_v8  ;;  %v507_v8 = vsub.s32 1, %v502_v16 }
  0xec   : > { %756 = vmatmul.mubr.f32.vlgmr.msra.gmra.mrb[4].mxu1 %v2593_v18  ;;  %v2343_v18 = vmov 1934713408  }
  0xed   : > { %v795_v50 = vunpack.c.l.s4 %v2343_v18  ;;  %v2610_v54 = vrot.slane %v499_v41, %v507_v8 }
  0xef   : > { %v796_v56 = vunpack.c.0.s8 %v795_v50 }
  0xf1   : > { %v2620_v4 = vsub.s32 %v796_v56, %v502_v16 }
 0x17e   : > { %v597_v58 = vpop.f32.mrb[0].mxu0 }
 0x17f   : > { %v598_v59 = vadd.f32 %v597_v58, %v504_v52  ;;  %v674_v60 = vpop.f32.mrb[0].mxu1  ;;  %v599_v61 = vpop.f32.mrb[1].mxu0 }
 0x180   : > { %v675_v62 = vadd.f32 %v674_v60, %v2608_v53  ;;  %v600_v63 = vadd.f32 %v599_v61, %v2610_v54  ;;  %v676_v0 = vpop.f32.mrb[1].mxu1 }
 0x181   : > { %v762_v2 = vcombine.high %v598_v59, %v2344_v1  ;;  %v769_v3 = vrot.slane %v598_v59, %v2612_v55  ;;  %v677_v5 = vadd.f32 %v676_v0, %v2614_v57 }
 0x182   : > { %v998_v6 = vcombine.high %v675_v62, %v2344_v1  ;;  %v1005_v7 = vrot.slane %v675_v62, %v2612_v55  ;;  %v777_v9 = vcombine.high %v600_v63, %v2344_v1  ;;  %v784_v10 = vrot.slane %v600_v63, %v2612_v55  ;;  %v603_v11 = vpop.f32.mrb[2].mxu0 }
 0x183   : > { %v776_v12 = vrot.slane %v762_v2, %v2612_v55  ;;  %v1013_v13 = vcombine.high %v677_v5, %v2344_v1  ;;  %v1020_v14 = vrot.slane %v677_v5, %v2612_v55  ;;  %v604_v15 = vadd.f32 %v603_v11, %v504_v52  ;;  %v680_v17 = vpop.f32.mrb[2].mxu1  ;;  %v605_v19 = vpop.f32.mrb[3].mxu0 }
 0x184   : > { %v1012_v20 = vrot.slane %v998_v6, %v2612_v55  ;;  %v791_v21 = vrot.slane %v777_v9, %v2612_v55  ;;  %v792_v22 = vcombine.low %v769_v3, %v784_v10  ;;  %v793_v23 = vcombine.high %v769_v3, %v784_v10  ;;  %v682_v24 = vpop.f32.mrb[3].mxu1 }
 0x185   : > { %v1027_v25 = vrot.slane %v1013_v13, %v2612_v55  ;;  %v1028_v26 = vcombine.low %v1005_v7, %v1020_v14  ;;  %v1029_v27 = vcombine.high %v1005_v7, %v1020_v14  ;;  %v828_v28 = vcombine.high %v604_v15, %v2344_v1 }
 0x186   : > { %v800_v29 = vrot.slane %v792_v22, %v2620_v4  ;;  %v807_v30 = vrot.slane %v793_v23, %v2620_v4  ;;  %v808_v31 = vcombine.low %v776_v12, %v791_v21  ;;  %v809_v32 = vcombine.high %v776_v12, %v791_v21 }
 0x187   : > { %v1036_v33 = vrot.slane %v1028_v26, %v2620_v4  ;;  %v1043_v34 = vrot.slane %v1029_v27, %v2620_v4  ;;  %v1044_v35 = vcombine.low %v1012_v20, %v1027_v25  ;;  %v1045_v36 = vcombine.high %v1012_v20, %v1027_v25 }
 0x188   : > { %v816_v37 = vrot.slane %v808_v31, %v2620_v4  ;;  %v823_v38 = vrot.slane %v809_v32, %v2620_v4  ;;  %v894_v39 = vcombine.low %v800_v29, %v807_v30  ;;  %v1802_v16 = vcombine.high %v800_v29, %v807_v30 }
 0x189   : > { %v1052_v40 = vrot.slane %v1044_v35, %v2620_v4  ;;  %v1059_v41 = vrot.slane %v1045_v36, %v2620_v4  ;;  %v1130_v43 = vcombine.low %v1036_v33, %v1043_v34  ;;  %v1806_v45 = vcombine.high %v1036_v33, %v1043_v34 }
 0x18a   : > { %v901_v46 = vrot.slane %v894_v39, %v2612_v55  ;;  %v909_v47 = vrot.slane %v1802_v16, %v2612_v55  ;;  %v910_v48 = vcombine.low %v816_v37, %v823_v38  ;;  %v1803_v8 = vcombine.high %v816_v37, %v823_v38 }
 0x18b   : > { %v1137_v49 = vrot.slane %v1130_v43, %v2612_v55  ;;  %v1145_v18 = vrot.slane %v1806_v45, %v2612_v55  ;;  %v1146_v50 = vcombine.low %v1052_v40, %v1059_v41  ;;  %v1807_v51 = vcombine.high %v1052_v40, %v1059_v41 }
 0x18c   : > { %v917_v52 = vrot.slane %v910_v48, %v2612_v55  ;;  %v925_v56 = vrot.slane %v1803_v8, %v2612_v55  ;;  %v926_v58 = vcombine.low %v901_v46, %v909_v47  ;;  %v835_v62 = vrot.slane %v604_v15, %v2612_v55 }
 0x18d   : > { %v1153_v59 = vrot.slane %v1146_v50, %v2612_v55  ;;  %v1161_v60 = vrot.slane %v1807_v51, %v2612_v55  ;;  %v1162_v61 = vcombine.low %v1137_v49, %v1145_v18  ;;  %v842_v0 = vrot.slane %v828_v28, %v2612_v55 }
 0x18e   : > { %v934_v63 = vcombine.low %v917_v52, %v925_v56  ;;  %v681_v2 = vadd.f32 %v680_v17, %v2608_v53  ;;  %v606_v3 = vadd.f32 %v605_v19, %v2610_v54  ;;  %v933_v5 = vrot.slane %v926_v58, %v2620_v4 }
 0x18f   : > { %v1169_v6 = vrot.slane %v1162_v61, %v2620_v4  ;;  %v1170_v7 = vcombine.low %v1153_v59, %v1161_v60  ;;  %v683_v9 = vadd.f32 %v682_v24, %v2614_v57 }
 0x190   : > { %v941_v10 = vrot.slane %v934_v63, %v2620_v4  ;;  %v1064_v11 = vcombine.high %v681_v2, %v2344_v1  ;;  %v1071_v12 = vrot.slane %v681_v2, %v2612_v55  ;;  %v843_v13 = vcombine.high %v606_v3, %v2344_v1 }
 0x191   : > { %v1177_v53 = vrot.slane %v1170_v7, %v2620_v4  ;;  %v850_v54 = vrot.slane %v606_v3, %v2612_v55  ;;  %v1079_v14 = vcombine.high %v683_v9, %v2344_v1  ;;  %v1086_v15 = vrot.slane %v683_v9, %v2612_v55 }
 0x192   : > { %v942_v17 = vcombine.low %v933_v5, %v941_v10  ;;  %v943_v57 = vcombine.high %v933_v5, %v941_v10  ;;  %v1078_v19 = vrot.slane %v1064_v11, %v2612_v55  ;;  %v857_v20 = vrot.slane %v843_v13, %v2612_v55 }
 0x193   : > { %v1178_v21 = vcombine.low %v1169_v6, %v1177_v53  ;;  %v1179_v22 = vcombine.high %v1169_v6, %v1177_v53  ;;  %v858_v23 = vcombine.low %v835_v62, %v850_v54  ;;  %v859_v24 = vcombine.high %v835_v62, %v850_v54 }
 0x194   : > { %994 = vst [vmem:[%s2668_s30] sm:$0xff] %v942_v17  ;;  %996 = vst [vmem:[%s2668_s30 + $0x10] sm:$0xff] %v943_v57  ;;  %v874_v25 = vcombine.low %v842_v0, %v857_v20  ;;  %v875_v26 = vcombine.high %v842_v0, %v857_v20  ;;  %v1093_v27 = vrot.slane %v1079_v14, %v2612_v55 }
 0x195   : > { %v1094_v28 = vcombine.low %v1071_v12, %v1086_v15  ;;  %1230 = vst [vmem:[%s2674_s14] sm:$0xff] %v1178_v21  ;;  %1232 = vst [vmem:[%s2674_s14 + $0x10] sm:$0xff] %v1179_v22  ;;  %v866_v29 = vrot.slane %v858_v23, %v2620_v4  ;;  %v873_v30 = vrot.slane %v859_v24, %v2620_v4 }
 0x196   : > { %v1095_v31 = vcombine.high %v1071_v12, %v1086_v15  ;;  %v882_v32 = vrot.slane %v874_v25, %v2620_v4  ;;  %v889_v33 = vrot.slane %v875_v26, %v2620_v4  ;;  %v1110_v35 = vcombine.low %v1078_v19, %v1093_v27 }
 0x197   : > { %v1102_v34 = vrot.slane %v1094_v28, %v2620_v4  ;;  %v944_v36 = vcombine.low %v866_v29, %v873_v30  ;;  %v1804_v37 = vcombine.high %v866_v29, %v873_v30  ;;  %v1111_v39 = vcombine.high %v1078_v19, %v1093_v27 }
 0x198   : > { %v1109_v38 = vrot.slane %v1095_v31, %v2620_v4  ;;  %v960_v16 = vcombine.low %v882_v32, %v889_v33  ;;  %v1805_v40 = vcombine.high %v882_v32, %v889_v33  ;;  %v1118_v41 = vrot.slane %v1110_v35, %v2620_v4 }
 0x199   : > { %v951_v43 = vrot.slane %v944_v36, %v2612_v55  ;;  %v959_v45 = vrot.slane %v1804_v37, %v2612_v55  ;;  %v1125_v46 = vrot.slane %v1111_v39, %v2620_v4 }
 0x19a   : > { %v1180_v47 = vcombine.low %v1102_v34, %v1109_v38  ;;  %v967_v48 = vrot.slane %v960_v16, %v2612_v55  ;;  %v975_v8 = vrot.slane %v1805_v40, %v2612_v55  ;;  %v1808_v49 = vcombine.high %v1102_v34, %v1109_v38 }
 0x19b   : > { %v976_v18 = vcombine.low %v951_v43, %v959_v45  ;;  %v1196_v51 = vcombine.low %v1118_v41, %v1125_v46  ;;  %v1809_v52 = vcombine.high %v1118_v41, %v1125_v46 }
 0x19c   : > { %v1187_v50 = vrot.slane %v1180_v47, %v2612_v55  ;;  %v984_v56 = vcombine.low %v967_v48, %v975_v8  ;;  %v1195_v58 = vrot.slane %v1808_v49, %v2612_v55 }
 0x19d   : > { %v983_v59 = vrot.slane %v976_v18, %v2620_v4  ;;  %v1203_v60 = vrot.slane %v1196_v51, %v2612_v55  ;;  %v1211_v61 = vrot.slane %v1809_v52, %v2612_v55 }
 0x19e   : > { %v991_v62 = vrot.slane %v984_v56, %v2620_v4  ;;  %v1212_v63 = vcombine.low %v1187_v50, %v1195_v58 }
 0x19f   : > { %v1220_v0 = vcombine.low %v1203_v60, %v1211_v61 }
 0x1a0   : > { %v992_v2 = vcombine.low %v983_v59, %v991_v62  ;;  %v993_v3 = vcombine.high %v983_v59, %v991_v62  ;;  %v1219_v5 = vrot.slane %v1212_v63, %v2620_v4 }
 0x1a1   : > { %v1227_v6 = vrot.slane %v1220_v0, %v2620_v4 }
 0x1a2   : > { %995 = vst [vmem:[%s2668_s30 + $0x8] sm:$0xff] %v992_v2  ;;  %997 = vst [vmem:[%s2668_s30 + $0x18] sm:$0xff] %v993_v3 }
 0x1a3   : > { %v1228_v7 = vcombine.low %v1219_v5, %v1227_v6  ;;  %v1229_v9 = vcombine.high %v1219_v5, %v1227_v6 }
 0x1a5   : > { %1231 = vst [vmem:[%s2674_s14 + $0x8] sm:$0xff] %v1228_v7  ;;  %1233 = vst [vmem:[%s2674_s14 + $0x18] sm:$0xff] %v1229_v9 }
 0x1be   : > { %v751_v10 = vpop.f32.mrb[4].mxu0 }
 0x1bf   : > { %v752_v11 = vadd.f32 %v751_v10, %v2603_v42  ;;  %v757_v12 = vpop.f32.mrb[4].mxu1  ;;  %v753_v13 = vpop.f32.mrb[5].mxu0 }
 0x1c0   : > { %v758_v53 = vadd.f32 %v757_v12, %v2603_v42  ;;  %v754_v54 = vadd.f32 %v753_v13, %v2605_v44  ;;  %v759_v14 = vpop.f32.mrb[5].mxu1 }
 0x1c1   : > { %v1234_v15 = vcombine.high %v752_v11, %v2344_v1  ;;  %v1241_v17 = vrot.slane %v752_v11, %v2612_v55  ;;  %v760_v57 = vadd.f32 %v759_v14, %v2605_v44 }
 0x1c2   : > { %v1300_v19 = vcombine.high %v758_v53, %v2344_v1  ;;  %v1307_v20 = vrot.slane %v758_v53, %v2612_v55  ;;  %v1249_v21 = vcombine.high %v754_v54, %v2344_v1  ;;  %v1256_v22 = vrot.slane %v754_v54, %v2612_v55 }
 0x1c3   : > { %v1248_v23 = vrot.slane %v1234_v15, %v2612_v55  ;;  %v1315_v42 = vcombine.high %v760_v57, %v2344_v1  ;;  %v1322_v24 = vrot.slane %v760_v57, %v2612_v55 }
 0x1c4   : > { %v1314_v25 = vrot.slane %v1300_v19, %v2612_v55  ;;  %v1263_v26 = vrot.slane %v1249_v21, %v2612_v55  ;;  %v1264_v27 = vcombine.low %v1241_v17, %v1256_v22  ;;  %v1265_v44 = vcombine.high %v1241_v17, %v1256_v22 }
 0x1c5   : > { %v1329_v28 = vrot.slane %v1315_v42, %v2612_v55  ;;  %v1330_v29 = vcombine.low %v1307_v20, %v1322_v24  ;;  %v1331_v30 = vcombine.high %v1307_v20, %v1322_v24 }
 0x1c6   : > { %v1272_v31 = vrot.slane %v1264_v27, %v2620_v4  ;;  %v1279_v32 = vrot.slane %v1265_v44, %v2620_v4  ;;  %v1280_v33 = vcombine.low %v1248_v23, %v1263_v26  ;;  %v1281_v34 = vcombine.high %v1248_v23, %v1263_v26 }
 0x1c7   : > { %v1338_v1 = vrot.slane %v1330_v29, %v2620_v4  ;;  %v1345_v35 = vrot.slane %v1331_v30, %v2620_v4  ;;  %v1346_v36 = vcombine.low %v1314_v25, %v1329_v28  ;;  %v1347_v37 = vcombine.high %v1314_v25, %v1329_v28 }
 0x1c8   : > { %v1288_v38 = vrot.slane %v1280_v33, %v2620_v4  ;;  %v1295_v39 = vrot.slane %v1281_v34, %v2620_v4  ;;  %v1366_v16 = vcombine.low %v1272_v31, %v1279_v32  ;;  %v1810_v40 = vcombine.high %v1272_v31, %v1279_v32 }
 0x1c9   : > { %v1354_v41 = vrot.slane %v1346_v36, %v2620_v4  ;;  %v1361_v43 = vrot.slane %v1347_v37, %v2620_v4  ;;  %v1416_v45 = vcombine.low %v1338_v1, %v1345_v35  ;;  %v1812_v46 = vcombine.high %v1338_v1, %v1345_v35 }
 0x1ca   : > { %v1373_v47 = vrot.slane %v1366_v16, %v2612_v55  ;;  %v1381_v48 = vrot.slane %v1810_v40, %v2612_v55  ;;  %v1382_v8 = vcombine.low %v1288_v38, %v1295_v39  ;;  %v1811_v49 = vcombine.high %v1288_v38, %v1295_v39 }
 0x1cb   : > { %v1423_v18 = vrot.slane %v1416_v45, %v2612_v55  ;;  %v1431_v50 = vrot.slane %v1812_v46, %v2612_v55  ;;  %v1432_v51 = vcombine.low %v1354_v41, %v1361_v43  ;;  %v1813_v52 = vcombine.high %v1354_v41, %v1361_v43 }
 0x1cc   : > { %v1389_v56 = vrot.slane %v1382_v8, %v2612_v55  ;;  %v1397_v58 = vrot.slane %v1811_v49, %v2612_v55  ;;  %v1398_v59 = vcombine.low %v1373_v47, %v1381_v48 }
 0x1cd   : > { %v1439_v60 = vrot.slane %v1432_v51, %v2612_v55  ;;  %v1447_v61 = vrot.slane %v1813_v52, %v2612_v55  ;;  %v1448_v62 = vcombine.low %v1423_v18, %v1431_v50 }
 0x1ce   : > { %v1406_v63 = vcombine.low %v1389_v56, %v1397_v58  ;;  %v1405_v2 = vrot.slane %v1398_v59, %v2620_v4 }
 0x1cf   : > { %v1456_v0 = vcombine.low %v1439_v60, %v1447_v61  ;;  %v1455_v5 = vrot.slane %v1448_v62, %v2620_v4 }
 0x1d0   : > { %v1413_v3 = vrot.slane %v1406_v63, %v2620_v4 }
 0x1d1   : > { %v1463_v6 = vrot.slane %v1456_v0, %v2620_v4 }
 0x1d2   : > { %v1414_v7 = vcombine.low %v1405_v2, %v1413_v3  ;;  %v1415_v9 = vcombine.high %v1405_v2, %v1413_v3 }
 0x1d3   : > { %v1464_v10 = vcombine.low %v1455_v5, %v1463_v6  ;;  %v1465_v11 = vcombine.high %v1455_v5, %v1463_v6 }
 0x1d4   : > { %1466 = vst [vmem:[%s2739_s27] sm:$0xff] %v1414_v7  ;;  %1468 = vst [vmem:[%s2739_s27 + $0x10] sm:$0xff] %v1415_v9 }
 0x1d5   : > { %1467 = vst [vmem:[%s2739_s27 + $0x8] sm:$0xff] %v1464_v10  ;;  %1469 = vst [vmem:[%s2739_s27 + $0x18] sm:$0xff] %v1465_v11 }
 0x1d6   : > { %s1817_s15 = sshll.u32 %s2318_s21, 1  ;;  %s1818_s16 = sshll.u32 %s2322_s22, 3 }
 0x1d7   : > { %s1493_s17 = sadd.s32 %s1818_s16, %s1817_s15  ;;  %s1512_s6 = sshll.u32 %s2668_s30, 4  ;;  %s1513_s6 = int_to_ptr.vmem [resolvable:$true] %s1512_s6 }
 0x1d8   : > { %s2753_s9 = sshll.u32 %s1493_s17, 7  ;;  %s2345_s13 = smov 256  }
 0x1d9   : > { %s1495_s29 = scalar_lea.hbm %s2846_s3, %s2753_s9  ;;  %2059 = sst [smem:[#allocation12]] (%p2499_p11), %s2345_s13 }
 0x1da   : > { %s2346_s23 = smov 512   ;;  %s2347_s21 = smov 2  }
 0x1db   : > { %2060 = sst [smem:[#allocation12 + $0x1]] (%p2499_p11), %s2346_s23  ;;  %s2348_s22 = smov 128  }
 0x1dc   : > { %2061 = sst [smem:[#allocation12 + $0x2]] (%p2499_p11), %s2347_s21  ;;  %s2349_s12 = smov 8  }
 0x1dd   : > { %2062 = sst [smem:[#allocation12 + $0x3]] (%p2499_p11), %s2348_s22  ;;  %s2350_s1 = smov [#allocation11]  }
 0x1de   : > { %2063 = sst [smem:[#allocation12 + $0x4]] (%p2499_p11), %s2348_s22  ;;  %s2351_s5 = smov 0  }
 0x1df   : > { %2064 = sst [smem:[#allocation12 + $0x5]] (%p2499_p11), %s2349_s12 }
 0x1e0   : > { %2065 = dma.general (%p2499_p11), %s1513_s6, 512, %s1495_s29, %s1471_s18, %s2350_s1, [#allocation12], %s2351_s5, 0  }
 0x1e1   : > { %s1542_s15 = scalar_lea.hbm %s2847_s4, %s2753_s9  ;;  %s1559_s16 = sshll.u32 %s2674_s14, 4  ;;  %s1560_s16 = int_to_ptr.vmem [resolvable:$true] %s1559_s16 }
 0x1e2   : > { %s2352_s17 = smov 256   ;;  %s2353_s18 = smov 512  }
 0x1e3   : > { %2066 = sst [smem:[#allocation14]] (%p2499_p11), %s2352_s17  ;;  %s2354_s6 = smov 2  }
 0x1e4   : > { %2067 = sst [smem:[#allocation14 + $0x1]] (%p2499_p11), %s2353_s18  ;;  %s2355_s26 = smov 128  }
 0x1e5   : > { %2068 = sst [smem:[#allocation14 + $0x2]] (%p2499_p11), %s2354_s6  ;;  %s2356_s10 = smov 8  }
 0x1e6   : > { %2069 = sst [smem:[#allocation14 + $0x3]] (%p2499_p11), %s2355_s26  ;;  %s2357_s29 = smov [#allocation13]  }
 0x1e7   : > { %2070 = sst [smem:[#allocation14 + $0x4]] (%p2499_p11), %s2355_s26  ;;  %s2358_s14 = smov 0  }
 0x1e8   : > { %2071 = sst [smem:[#allocation14 + $0x5]] (%p2499_p11), %s2356_s10 }
 0x1e9   : > { %2072 = dma.general (%p2499_p11), %s1560_s16, 512, %s1542_s15, %s2748_s7, %s2357_s29, [#allocation14], %s2358_s14, 0  }
 0x1ea   : > { %s2878_s21 = sld [smem:[#allocation27_spill]]  ;;  %s1606_s12 = sshll.u32 %s2739_s27, 4  ;;  %s1607_s12 = int_to_ptr.vmem [resolvable:$true] %s1606_s12 }
 0x1eb   : > { %s2359_s1 = smov 256   ;;  %s2360_s5 = smov 512  }
 0x1ec   : > { %2073 = sst [smem:[#allocation16]] (%p2499_p11), %s2359_s1  ;;  %s2361_s28 = smov 2  }
 0x1ed   : > { %2074 = sst [smem:[#allocation16 + $0x1]] (%p2499_p11), %s2360_s5  ;;  %s2362_s30 = smov 128  }
 0x1ee   : > { %2075 = sst [smem:[#allocation16 + $0x2]] (%p2499_p11), %s2361_s28  ;;  %s2363_s15 = smov 8  }
 0x1ef   : > { %2076 = sst [smem:[#allocation16 + $0x3]] (%p2499_p11), %s2362_s30  ;;  %s2365_s27 = smov 0  }
 0x1f0   : > { %s1589_s22 = scalar_lea.hbm %s2878_s21, %s2753_s9  ;;  %2077 = sst [smem:[#allocation16 + $0x4]] (%p2499_p11), %s2362_s30 }
 0x1f1   : > { %2078 = sst [smem:[#allocation16 + $0x5]] (%p2499_p11), %s2363_s15  ;;  %s2364_s9 = smov [#allocation15]  }
 0x1f2   : > { %2079 = dma.general (%p2499_p11), %s1607_s12, 512, %s1589_s22, %s2748_s7, %s2364_s9, [#allocation16], %s2365_s27, 0  }
 0x1f3 PF: > { %s2879_s16 = sld [smem:[#allocation21_spill]]  ;;  %s2880_s17 = sld [smem:[#allocation23_spill]] }
 0x1f4   : > { %p2104_p8 = scmp.ge.s32.totalorder %s2334_s25, 2 }
 0x1f9   : > { %s1634_s18 = sand.u32 1, %s2879_s16   ;;  %p2881_p10 = scmp.ne.s32.totalorder %s2880_s17, 0 }
 0x1fa   : > { %s1635_s6 = scalar_lea.sflag [#allocation4], %s1634_s18 }
 0x1fb   : > { %p2092_p12 = pnand %p2104_p8, %p2881_p10 }
 0x1fd   : > { %2297 = dma.done.wait (!%p2092_p12), %s1635_s6, 512  }
 0x1fe   : > { %2299 = vsyncadd (!%p2092_p12), %s1635_s6, 4294966784  ;;  %s2882_s26 = sadd.s32 4294967294, %s2334_s25  }
 0x1ff   : > { %s1643_s10 = sand.u32 1, %s2882_s26  }
 0x200   : > { %s1644_s29 = scalar_lea.sflag [#allocation9], %s1643_s10 }
 0x201   : > { %2301 = dma.done.wait (!%p2092_p12), %s1644_s29, 1024  }
 0x202   : > { %2303 = vsyncadd (!%p2092_p12), %s1644_s29, 4294966272  ;;  %s26_s25 = sadd.s32 1, %s2334_s25   ;;  %s2883_s21 = sld [smem:[#allocation22_spill]] }
 0x203   : > { %p23_p11 = scmp.ge.s32.totalorder %s26_s25, 6   ;;  %s2884_s23 = sld [smem:[#allocation24_spill]] }
 0x204   : > { %s2885_s8 = sld [smem:[#allocation25_spill]]  ;;  %s2886_s18 = smov %s2310_s19 }
 0x205   : > { %s2887_s19 = smov %s2314_s20  ;;  %s2888_s20 = smov %s2516_s11 }
 0x206   : > { %s2889_s22 = smov %s2330_s24  ;;  %25 = sbr.rel (!%p23_p11) target bundleno = 13 (0xd), region = 128 }
 0x20a   : > { %s2890_s24 = smov %s2885_s8 }
 0x20d   :  { %1658 = vsyncpa [#allocation3], 1 }
 0x20e   :  { %1660 = vsyncpa [#allocation3 + $0x1], 1 }
 0x20f   :  { %1661 = vsyncpa [#allocation6], 1 }
 0x210   :  { %1662 = vsyncpa [#allocation4], 1 }
 0x211   :  { %1664 = vsyncpa [#allocation4 + $0x1], 1 }
 0x212   :  { %1665 = vsyncpa [#allocation9], 1 }
 0x213   :  { %1667 = vsyncpa [#allocation9 + $0x1], 1 }

</bundles_post_ra>
